<compile_context>
chip_gen: v7x
topology: tpu7x:2x2x1
jax: 0.10.0
libtpu: 0.0.40
codegen_flags: <defaults>
</compile_context>

<pallas_src>
import jax
import jax.numpy as jnp
import numpy as np
from jax.experimental import pallas as pl
from jax.experimental.pallas import tpu as pltpu


# ----------------------------------------------------------------------------
# Pallas kernel: one grid step == t_blk serial time steps of the fused
# (fwd+bwd, batch-stacked) recurrence. Only the state-dependent work remains:
# one fused [h|c] @ W_blk matmul plus the gate/cell elementwise math.
# ----------------------------------------------------------------------------
def ftlstm_chunk_kernel(xw_ref, tm1_ref, wblk_hbm, bd_ref,
                        hhis_ref, clast_ref,
                        wblk_scr, h_scr, c_scr, dma_sem):
    blk = pl.program_id(0)

    @pl.when(blk == 0)
    def _():
        # Grid-invariant fused weight: load ONCE into a resident, single-
        # buffered VMEM scratch instead of letting the pipeliner double-buffer.
        cp = pltpu.make_async_copy(wblk_hbm, wblk_scr, dma_sem)
        cp.start()
        cp.wait()
        h_scr[...] = jnp.zeros_like(h_scr)
        c_scr[...] = jnp.zeros_like(c_scr)

    h = h_scr[...]                       # (2B, H) carried hidden
    c = c_scr[...]                       # (2B, H) carried cell
    W_blk = wblk_scr[...]                # (2H, 5H) = [[U, 0], [0, W_decomp]]
    bd = bd_ref[...]                     # (1, H)
    H = h.shape[1]

    t_blk = xw_ref.shape[0]              # static python int -> loop fully unrolls
    for tb in range(t_blk):
        xw = xw_ref[tb]                  # (2B, 4H)  precomputed x@W + gate bias
        tm1 = tm1_ref[tb]                # (2B, 1)   precomputed clamp(T) - 1

        # One MXU push per serial step: [h | c] @ [[U, 0], [0, W_decomp]]
        hc = jnp.concatenate([h, c], axis=1)                              # (2B, 2H)
        proj = jnp.dot(hc, W_blk, preferred_element_type=jnp.float32)     # (2B, 5H)

        # cell decomposition / time discounting: c - C_ST + T*C_ST
        C_ST = jnp.tanh(proj[:, 4 * H:] + bd)
        c_adj = c + tm1 * C_ST           # (2B,1) broadcasts along H

        # fused gates [i | f | o | C] (candidate C uses sigmoid, as in torch)
        gates = jax.nn.sigmoid(xw + proj[:, :4 * H])
        i_g = gates[:, 0 * H:1 * H]
        f_g = gates[:, 1 * H:2 * H]
        o_g = gates[:, 2 * H:3 * H]
        c_g = gates[:, 3 * H:4 * H]

        c = f_g * c_adj + i_g * c_g
        h = o_g * jnp.tanh(c)
        # batch-major, lane-dense (H last) history writeback
        hhis_ref[:, pl.ds(tb, 1), :] = h[:, None, :]

    h_scr[...] = h
    c_scr[...] = c

    @pl.when(blk == pl.num_programs(0) - 1)
    def _():
        clast_ref[...] = c


def _pick_t_blk(S, BB, H, budget_bytes=(24 << 20)):
    """Largest multiple-of-8 divisor of S whose streamed blocks fit the budget."""
    per_step = 4 * 2 * (BB * 4 * H + BB * H + max(BB, 8) * 128)  # dbl-buffered
    cap = max(8, (int(budget_bytes) // max(per_step, 1)) // 8 * 8)
    best = None
    for cand in range(8, min(S, cap) + 1, 8):
        if S % cand == 0:
            best = cand
    if best is not None:
        return best
    # No multiple-of-8 divisor <= cap: fall back to the whole sequence (full-
    # extent block dims are always layout-legal).
    # TODO(synk): pad S to a multiple of 8 and slice outputs instead.
    return S


def _vmem_limit_bytes(BB, H, t_blk):
    f = 4
    bbp = max(BB, 8)
    stream = 2 * f * (t_blk * BB * 4 * H     # xw blocks (double-buffered)
                      + BB * t_blk * H       # hidden-history blocks
                      + t_blk * bbp * 128)   # (T-1) blocks (lane-padded)
    resident = f * ((2 * H) * (5 * H)        # fused weight scratch (single buf)
                    + 3 * BB * H             # h/c scratch + c_last
                    + 2 * 8 * 128)           # b_decomp (padded, double-buffered)
    total = stream + resident + (4 << 20)
    return int(min(max(total, 32 << 20), 64 << 20))


def _run_fused(xw_eff, tm1_eff, w_blk, bd, *, t_blk):
    S, BB, G = xw_eff.shape              # BB = 2B, G = 4H
    H = G // 4
    f32 = jnp.float32

    return pl.pallas_call(
        ftlstm_chunk_kernel,
        grid=(S // t_blk,),
        in_specs=[
            pl.BlockSpec((t_blk, BB, G), lambda s: (s, 0, 0)),   # x@W + b chunk
            pl.BlockSpec((t_blk, BB, 1), lambda s: (s, 0, 0)),   # (T-1) chunk
            pl.BlockSpec(memory_space=pl.ANY),                   # fused weight (HBM)
            pl.BlockSpec((1, H), lambda s: (0, 0)),              # b_decomp
        ],
        out_specs=(
            pl.BlockSpec((BB, t_blk, H), lambda s: (0, s, 0)),   # history, batch-major
            pl.BlockSpec((BB, H), lambda s: (0, 0)),             # final cell
        ),
        out_shape=(
            jax.ShapeDtypeStruct((BB, S, H), f32),
            jax.ShapeDtypeStruct((BB, H), f32),
        ),
        scratch_shapes=[
            pltpu.VMEM((2 * H, 5 * H), f32),   # resident fused recurrent weight
            pltpu.VMEM((BB, H), f32),          # carried hidden state
            pltpu.VMEM((BB, H), f32),          # carried cell state
            pltpu.SemaphoreType.DMA,           # weight-load completion
        ],
        compiler_params=pltpu.CompilerParams(
            dimension_semantics=("arbitrary",),
            vmem_limit_bytes=_vmem_limit_bytes(BB, H, t_blk)),
    )(xw_eff, tm1_eff, w_blk, bd)


def _map_elapse_time(t, sc):
    """Time-decay map (elementwise in t). sc = [Wd1,Wd2,Wd3,a,b,m,k,d,n]."""
    wdec1, wdec2, wdec3 = sc[0], sc[1], sc[2]
    a_p, b_p, m_p, k_p, d_p, n_p = sc[3], sc[4], sc[5], sc[6], sc[7], sc[8]
    T1 = 1.0 / (a_p * jnp.power(t, b_p))
    T2 = k_p - m_p * t
    T3 = 1.0 / (1.0 + jnp.power(t / d_p, n_p))
    T = wdec1 * T1 + wdec2 * T2 + wdec3 * T3
    T = jnp.maximum(T, 0.0)
    T = jnp.minimum(T, 1.0)
    return T


@jax.jit
def ftlstm_forward(inputs, times, params):
    """inputs: (B, S, I) float32;  times: (B, S, 1) float32, t > 0 (batch_first)."""
    B, S, I = inputs.shape
    H = params["W_decomp"].shape[0]
    f32 = jnp.float32

    # --- hoisted, sequence-wide input projection with the gate bias folded in.
    xw = jnp.einsum("bsi,ig->sbg", inputs, params["W"]) + params["b"]   # (S,B,4H)

    # --- hoisted time-decay map for both directions; ship (T - 1) ------------
    t_tm = jnp.transpose(times, (1, 0, 2))                 # (S, B, 1) — tiny
    T_all = _map_elapse_time(t_tm, params["scalars"])      # (S, B, 1)
    # backward pass time indexing exactly as in the PyTorch module:
    #   step 0 uses times[0]; step i>0 uses flip(times)[i-1]
    T_bwd = jnp.concatenate([T_all[:1], jnp.flip(T_all, 0)[: S - 1]], axis=0)

    # --- fuse the two directions along the batch axis ------------------------
    xw_eff = jnp.concatenate([xw, jnp.flip(xw, 0)], axis=1)             # (S, 2B, 4H)
    tm1_eff = jnp.concatenate([T_all, T_bwd], axis=1) - 1.0             # (S, 2B, 1)

    # --- fused recurrent weight [[U, 0], [0, W_decomp]] -> one push per step --
    U, Wd = params["U"], params["W_decomp"]
    w_blk = jnp.concatenate([
        jnp.concatenate([U, jnp.zeros((H, H), f32)], axis=1),
        jnp.concatenate([jnp.zeros((H, 4 * H), f32), Wd], axis=1),
    ], axis=0)                                                           # (2H, 5H)

    t_blk = _pick_t_blk(S, 2 * B, H)
    h_his_eff, c_last_eff = _run_fused(
        xw_eff, tm1_eff, w_blk, params["b_decomp"], t_blk=t_blk)

    # --- split / concat to the PyTorch interface (no transpose pass) ---------
    h_f, h_b = h_his_eff[:B], h_his_eff[B:]                              # (B, S, H)
    hidden_his = jnp.concatenate([h_f, h_b], axis=2)                     # (B, S, 2H)
    h_final = jnp.concatenate([h_f[:, S - 1], h_b[:, S - 1]], axis=1)    # (B, 2H)
    c_final = jnp.concatenate([c_last_eff[:B], c_last_eff[B:]], axis=1)  # (B, 2H)
    return hidden_his, (h_final, c_final)


# ----------------------------------------------------------------------------
# Pure-JAX reference (direct transcription of the PyTorch module).
# Scalars live in a SEPARATE dict so the exponent "b" cannot clobber the bias.
# ----------------------------------------------------------------------------
def _scalars_dict(sc):
    names = ["W_decay_1", "W_decay_2", "W_decay_3", "a", "b", "m", "k", "d", "n"]
    return {nm: sc[i] for i, nm in enumerate(names)}


def _ref_map_elapse_time(t, s, H):
    T1 = 1.0 / (s["a"] * jnp.power(t, s["b"]))
    T2 = s["k"] - s["m"] * t
    T3 = 1.0 / (1.0 + jnp.power(t / s["d"], s["n"]))
    T = s["W_decay_1"] * T1 + s["W_decay_2"] * T2 + s["W_decay_3"] * T3
    T = jnp.minimum(jnp.maximum(T, 0.0), 1.0)
    return T @ jnp.ones((1, H), jnp.float32)


def _ref_unit(h, c, x, t, p, s, H):
    T = _ref_map_elapse_time(t, s, H)
    C_ST = jnp.tanh(jnp.dot(c, p["W_decomp"]) + p["b_decomp"])
    c = c - C_ST + T * C_ST
    gates = jnp.dot(x, p["W"]) + jnp.dot(h, p["U"]) + p["b"]
    gates = jax.nn.sigmoid(gates)
    i_g, f_g, o_g, c_g = (gates[:, k * H:(k + 1) * H] for k in range(4))
    c_new = f_g * c + i_g * c_g
    h_new = o_g * jnp.tanh(c_new)
    return h_new, c_new


def ftlstm_reference(inputs, times, params):
    B, S, I = inputs.shape
    H = params["W_decomp"].shape[0]
    s = _scalars_dict(params["scalars"])
    x_tm = jnp.transpose(inputs, (1, 0, 2))
    t_tm = jnp.transpose(times, (1, 0, 2))

    h = jnp.zeros((B, H), jnp.float32)
    c = jnp.zeros((B, H), jnp.float32)
    his = []
    for i in range(S):
        h, c = _ref_unit(h, c, x_tm[i], t_tm[i], params, s, H)
        his.append(h)
    his = jnp.stack(his)

    h2 = jnp.zeros((B, H), jnp.float32)
    c2 = jnp.zeros((B, H), jnp.float32)
    x_bwd = jnp.flip(x_tm, 0)
    t_flip = jnp.flip(t_tm, 0)
    his2 = []
    for i in range(S):
        t = t_tm[0] if i == 0 else t_flip[i - 1]
        h2, c2 = _ref_unit(h2, c2, x_bwd[i], t, params, s, H)
        his2.append(h2)
    his2 = jnp.stack(his2)

    hidden_his = jnp.concatenate([his, his2], axis=2)
    hidden_his = jnp.transpose(hidden_his, (1, 0, 2))
    return hidden_his, (jnp.concatenate([h, h2], axis=1),
                        jnp.concatenate([c, c2], axis=1))


# ----------------------------------------------------------------------------
# Deterministic parameter init (matches the module's __init__ shapes).
# ----------------------------------------------------------------------------
def init_params(key, input_size, hidden_size, initializer_range=0.02):
    keys = jax.random.split(key, 9)
    f32 = jnp.float32

    def nrm(k, shape):
        return (initializer_range * jax.random.normal(k, shape)).astype(f32)

    Wi, Wf, Wog, Wc = (nrm(keys[i], (input_size, hidden_size)) for i in range(4))
    Ui, Uf, Uog, Uc = (nrm(keys[4 + i], (hidden_size, hidden_size)) for i in range(4))
    W_decomp = nrm(keys[8], (hidden_size, hidden_size))

    return {
        "W": jnp.concatenate([Wi, Wf, Wog, Wc], axis=1),           # (I, 4H)
        "U": jnp.concatenate([Ui, Uf, Uog, Uc], axis=1),           # (H, 4H)
        "b": jnp.zeros((1, 4 * hidden_size), f32),                  # biases init to 0
        "W_decomp": W_decomp,                                        # (H, H)
        "b_decomp": jnp.zeros((1, hidden_size), f32),
        # [W_decay_1, W_decay_2, W_decay_3, a, b, m, k, d, n]
        "scalars": jnp.array([0.33, 0.33, 0.33, 1.0, 1.0, 0.02, 2.9, 4.5, 2.5],
                             dtype=f32),
    }


if __name__ == "__main__":
    B, S, I, H = 2, 8, 16, 32

    key = jax.random.PRNGKey(0)
    k_param, k_x, k_t = jax.random.split(key, 3)

    params = init_params(k_param, I, H)
    inputs = jax.random.normal(k_x, (B, S, I), dtype=jnp.float32)
    # elapsed times must be > 0 (t**b with real exponent)
    times = jax.random.uniform(k_t, (B, S, 1), dtype=jnp.float32,
                               minval=0.5, maxval=5.0)

    hidden_his, (h_fin, c_fin) = ftlstm_forward(inputs, times, params)
    jax.block_until_ready(hidden_his)

    # sanity check against a pure-JAX transcription of the PyTorch forward
    ref_his, (ref_h, ref_c) = ftlstm_reference(inputs, times, params)
    np.testing.assert_allclose(np.asarray(hidden_his), np.asarray(ref_his),
                               rtol=2e-3, atol=2e-3)
    np.testing.assert_allclose(np.asarray(h_fin), np.asarray(ref_h),
                               rtol=2e-3, atol=2e-3)
    np.testing.assert_allclose(np.asarray(c_fin), np.asarray(ref_c),
                               rtol=2e-3, atol=2e-3)

    assert hidden_his.shape == (B, S, 2 * H)
    assert h_fin.shape == (B, 2 * H) and c_fin.shape == (B, 2 * H)
    print("KERNEL_OK")
</pallas_src>

<mosaic_0001>
module attributes {stable_mosaic.version = 11 : i64} {
  func.func @ftlstm_chunk_kernel(%arg0: i32, %arg1: memref<8x4x128xf32, #tpu.memory_space<vmem>>, %arg2: memref<8x4x1xf32, #tpu.memory_space<vmem>>, %arg3: memref<64x160xf32, #tpu.memory_space<any>>, %arg4: memref<1x32xf32, #tpu.memory_space<vmem>>, %arg5: memref<4x8x32xf32, #tpu.memory_space<vmem>>, %arg6: memref<4x32xf32, #tpu.memory_space<vmem>>, %arg7: memref<64x160xf32, #tpu.memory_space<vmem>>, %arg8: memref<4x32xf32, #tpu.memory_space<vmem>>, %arg9: memref<4x32xf32, #tpu.memory_space<vmem>>, %arg10: memref<!tpu.dma_semaphore, #tpu.memory_space<semaphore_mem>>) attributes {dimension_semantics = [#tpu.dimension_semantics<arbitrary>], iteration_bounds = array<i64: 1>, scalar_prefetch = 0 : i64, scratch_operands = 4 : i64, tpu.core_type = #tpu.core_type<tc>, window_params = [{transform_indices = @transform_0, window_bounds = array<i64: 8, 4, 128>}, {transform_indices = @transform_1, window_bounds = array<i64: 8, 4, 1>}, {}, {pipeline_mode = #tpu.pipeline_mode<synchronous>, transform_indices = @transform_3, window_bounds = array<i64: 1, 32>}, {transform_indices = @transform_4, window_bounds = array<i64: 4, 8, 32>}, {pipeline_mode = #tpu.pipeline_mode<synchronous>, transform_indices = @transform_5, window_bounds = array<i64: 4, 32>}]} {
    %c0_i32 = arith.constant 0 : i32
    %0 = arith.cmpi eq, %arg0, %c0_i32 : i32
    %1 = arith.extui %0 : i1 to i32
    %c0_i32_0 = arith.constant 0 : i32
    %2 = arith.cmpi ne, %1, %c0_i32_0 : i32
    scf.if %2 {
      tpu.enqueue_dma source(%arg3 : memref<64x160xf32, #tpu.memory_space<any>>) target(%arg7 : memref<64x160xf32, #tpu.memory_space<vmem>>) target_semaphore(%arg10 : memref<!tpu.dma_semaphore, #tpu.memory_space<semaphore_mem>>)
      tpu.wait_dma2 semaphore(%arg10 : memref<!tpu.dma_semaphore, #tpu.memory_space<semaphore_mem>>) src(%arg3 : memref<64x160xf32, #tpu.memory_space<any>>) dst(%arg7 : memref<64x160xf32, #tpu.memory_space<vmem>>)
      %cst_94 = arith.constant 0.000000e+00 : f32
      %260 = vector.broadcast %cst_94 : f32 to vector<4x32xf32>
      %c0_95 = arith.constant 0 : index
      %c0_96 = arith.constant 0 : index
      %261 = vector.load %arg8[%c0_95, %c0_96] : memref<4x32xf32, #tpu.memory_space<vmem>>, vector<4x32xf32>
      tpu.vector_store %arg8[%c0_95, %c0_96], %260 {strides = array<i32>} : memref<4x32xf32, #tpu.memory_space<vmem>>, vector<4x32xf32>,
      %cst_97 = arith.constant 0.000000e+00 : f32
      %262 = vector.broadcast %cst_97 : f32 to vector<4x32xf32>
      %c0_98 = arith.constant 0 : index
      %c0_99 = arith.constant 0 : index
      %263 = vector.load %arg9[%c0_98, %c0_99] : memref<4x32xf32, #tpu.memory_space<vmem>>, vector<4x32xf32>
      tpu.vector_store %arg9[%c0_98, %c0_99], %262 {strides = array<i32>} : memref<4x32xf32, #tpu.memory_space<vmem>>, vector<4x32xf32>,
    } else {
    }
    %c0 = arith.constant 0 : index
    %c0_1 = arith.constant 0 : index
    %3 = vector.load %arg8[%c0, %c0_1] : memref<4x32xf32, #tpu.memory_space<vmem>>, vector<4x32xf32>
    %c0_2 = arith.constant 0 : index
    %c0_3 = arith.constant 0 : index
    %4 = vector.load %arg9[%c0_2, %c0_3] : memref<4x32xf32, #tpu.memory_space<vmem>>, vector<4x32xf32>
    %c0_4 = arith.constant 0 : index
    %c0_5 = arith.constant 0 : index
    %5 = vector.load %arg7[%c0_4, %c0_5] : memref<64x160xf32, #tpu.memory_space<vmem>>, vector<64x160xf32>
    %c0_6 = arith.constant 0 : index
    %c0_7 = arith.constant 0 : index
    %6 = vector.load %arg4[%c0_6, %c0_7] : memref<1x32xf32, #tpu.memory_space<vmem>>, vector<1x32xf32>
    %c0_8 = arith.constant 0 : index
    %c0_9 = arith.constant 0 : index
    %c0_10 = arith.constant 0 : index
    %7 = vector.load %arg1[%c0_8, %c0_9, %c0_10] : memref<8x4x128xf32, #tpu.memory_space<vmem>>, vector<1x4x128xf32>
    %8 = vector.shape_cast %7 : vector<1x4x128xf32> to vector<4x128xf32>
    %c0_11 = arith.constant 0 : index
    %c0_12 = arith.constant 0 : index
    %c0_13 = arith.constant 0 : index
    %9 = vector.load %arg2[%c0_11, %c0_12, %c0_13] : memref<8x4x1xf32, #tpu.memory_space<vmem>>, vector<1x4x1xf32>
    %10 = vector.shape_cast %9 : vector<1x4x1xf32> to vector<4x1xf32>
    %11 = tpu.concatenate %3, %4 in 1 : vector<4x32xf32>, vector<4x32xf32> -> vector<4x64xf32>
    %cst = arith.constant dense<0.000000e+00> : vector<4x160xf32>
    %12 = tpu.matmul %11, %5, %cst {dimension_numbers = #tpu.dot_dimension_numbers<[1], [0], [0], [1], [0, 0, 1, 1], [], []>} : vector<4x64xf32>, vector<64x160xf32>, vector<4x160xf32> -> vector<4x160xf32>
    %13 = vector.extract_strided_slice %12 {offsets = [0, 128], sizes = [4, 32], strides = [1, 1]} : vector<4x160xf32> to vector<4x32xf32>
    %14 = vector.broadcast %6 : vector<1x32xf32> to vector<4x32xf32>
    %15 = arith.addf %13, %14 : vector<4x32xf32>
    %16 = math.tanh %15 : vector<4x32xf32>
    %17 = vector.broadcast %10 : vector<4x1xf32> to vector<4x32xf32>
    %18 = arith.mulf %17, %16 : vector<4x32xf32>
    %19 = arith.addf %4, %18 : vector<4x32xf32>
    %20 = vector.extract_strided_slice %12 {offsets = [0, 0], sizes = [4, 128], strides = [1, 1]} : vector<4x160xf32> to vector<4x128xf32>
    %21 = arith.addf %8, %20 : vector<4x128xf32>
    %22 = arith.negf %21 : vector<4x128xf32>
    %23 = math.exp %22 : vector<4x128xf32>
    %cst_14 = arith.constant 1.000000e+00 : f32
    %24 = vector.broadcast %cst_14 : f32 to vector<4x128xf32>
    %25 = arith.addf %24, %23 : vector<4x128xf32>
    %26 = arith.divf %24, %25 : vector<4x128xf32>
    %27 = vector.extract_strided_slice %26 {offsets = [0, 0], sizes = [4, 32], strides = [1, 1]} : vector<4x128xf32> to vector<4x32xf32>
    %28 = vector.extract_strided_slice %26 {offsets = [0, 32], sizes = [4, 32], strides = [1, 1]} : vector<4x128xf32> to vector<4x32xf32>
    %29 = vector.extract_strided_slice %26 {offsets = [0, 64], sizes = [4, 32], strides = [1, 1]} : vector<4x128xf32> to vector<4x32xf32>
    %30 = vector.extract_strided_slice %26 {offsets = [0, 96], sizes = [4, 32], strides = [1, 1]} : vector<4x128xf32> to vector<4x32xf32>
    %31 = arith.mulf %28, %19 : vector<4x32xf32>
    %32 = arith.mulf %27, %30 : vector<4x32xf32>
    %33 = arith.addf %31, %32 : vector<4x32xf32>
    %34 = math.tanh %33 : vector<4x32xf32>
    %35 = arith.mulf %29, %34 : vector<4x32xf32>
    %36 = vector.shape_cast %35 : vector<4x32xf32> to vector<4x1x32xf32>
    %c0_15 = arith.constant 0 : index
    %c0_16 = arith.constant 0 : index
    %c0_17 = arith.constant 0 : index
    %37 = vector.load %arg5[%c0_15, %c0_16, %c0_17] : memref<4x8x32xf32, #tpu.memory_space<vmem>>, vector<4x1x32xf32>
    tpu.vector_store %arg5[%c0_15, %c0_16, %c0_17], %36 {strides = array<i32>} : memref<4x8x32xf32, #tpu.memory_space<vmem>>, vector<4x1x32xf32>,
    %c1 = arith.constant 1 : index
    %c0_18 = arith.constant 0 : index
    %c0_19 = arith.constant 0 : index
    %38 = vector.load %arg1[%c1, %c0_18, %c0_19] : memref<8x4x128xf32, #tpu.memory_space<vmem>>, vector<1x4x128xf32>
    %39 = vector.shape_cast %38 : vector<1x4x128xf32> to vector<4x128xf32>
    %c1_20 = arith.constant 1 : index
    %c0_21 = arith.constant 0 : index
    %c0_22 = arith.constant 0 : index
    %40 = vector.load %arg2[%c1_20, %c0_21, %c0_22] : memref<8x4x1xf32, #tpu.memory_space<vmem>>, vector<1x4x1xf32>
    %41 = vector.shape_cast %40 : vector<1x4x1xf32> to vector<4x1xf32>
    %42 = tpu.concatenate %35, %33 in 1 : vector<4x32xf32>, vector<4x32xf32> -> vector<4x64xf32>
    %cst_23 = arith.constant dense<0.000000e+00> : vector<4x160xf32>
    %43 = tpu.matmul %42, %5, %cst_23 {dimension_numbers = #tpu.dot_dimension_numbers<[1], [0], [0], [1], [0, 0, 1, 1], [], []>} : vector<4x64xf32>, vector<64x160xf32>, vector<4x160xf32> -> vector<4x160xf32>
    %44 = vector.extract_strided_slice %43 {offsets = [0, 128], sizes = [4, 32], strides = [1, 1]} : vector<4x160xf32> to vector<4x32xf32>
    %45 = vector.broadcast %6 : vector<1x32xf32> to vector<4x32xf32>
    %46 = arith.addf %44, %45 : vector<4x32xf32>
    %47 = math.tanh %46 : vector<4x32xf32>
    %48 = vector.broadcast %41 : vector<4x1xf32> to vector<4x32xf32>
    %49 = arith.mulf %48, %47 : vector<4x32xf32>
    %50 = arith.addf %33, %49 : vector<4x32xf32>
    %51 = vector.extract_strided_slice %43 {offsets = [0, 0], sizes = [4, 128], strides = [1, 1]} : vector<4x160xf32> to vector<4x128xf32>
    %52 = arith.addf %39, %51 : vector<4x128xf32>
    %53 = arith.negf %52 : vector<4x128xf32>
    %54 = math.exp %53 : vector<4x128xf32>
    %cst_24 = arith.constant 1.000000e+00 : f32
    %55 = vector.broadcast %cst_24 : f32 to vector<4x128xf32>
    %56 = arith.addf %55, %54 : vector<4x128xf32>
    %57 = arith.divf %55, %56 : vector<4x128xf32>
    %58 = vector.extract_strided_slice %57 {offsets = [0, 0], sizes = [4, 32], strides = [1, 1]} : vector<4x128xf32> to vector<4x32xf32>
    %59 = vector.extract_strided_slice %57 {offsets = [0, 32], sizes = [4, 32], strides = [1, 1]} : vector<4x128xf32> to vector<4x32xf32>
    %60 = vector.extract_strided_slice %57 {offsets = [0, 64], sizes = [4, 32], strides = [1, 1]} : vector<4x128xf32> to vector<4x32xf32>
    %61 = vector.extract_strided_slice %57 {offsets = [0, 96], sizes = [4, 32], strides = [1, 1]} : vector<4x128xf32> to vector<4x32xf32>
    %62 = arith.mulf %59, %50 : vector<4x32xf32>
    %63 = arith.mulf %58, %61 : vector<4x32xf32>
    %64 = arith.addf %62, %63 : vector<4x32xf32>
    %65 = math.tanh %64 : vector<4x32xf32>
    %66 = arith.mulf %60, %65 : vector<4x32xf32>
    %67 = vector.shape_cast %66 : vector<4x32xf32> to vector<4x1x32xf32>
    %c0_25 = arith.constant 0 : index
    %c1_26 = arith.constant 1 : index
    %c0_27 = arith.constant 0 : index
    %68 = vector.load %arg5[%c0_25, %c1_26, %c0_27] : memref<4x8x32xf32, #tpu.memory_space<vmem>>, vector<4x1x32xf32>
    tpu.vector_store %arg5[%c0_25, %c1_26, %c0_27], %67 {strides = array<i32>} : memref<4x8x32xf32, #tpu.memory_space<vmem>>, vector<4x1x32xf32>,
    %c2 = arith.constant 2 : index
    %c0_28 = arith.constant 0 : index
    %c0_29 = arith.constant 0 : index
    %69 = vector.load %arg1[%c2, %c0_28, %c0_29] : memref<8x4x128xf32, #tpu.memory_space<vmem>>, vector<1x4x128xf32>
    %70 = vector.shape_cast %69 : vector<1x4x128xf32> to vector<4x128xf32>
    %c2_30 = arith.constant 2 : index
    %c0_31 = arith.constant 0 : index
    %c0_32 = arith.constant 0 : index
    %71 = vector.load %arg2[%c2_30, %c0_31, %c0_32] : memref<8x4x1xf32, #tpu.memory_space<vmem>>, vector<1x4x1xf32>
    %72 = vector.shape_cast %71 : vector<1x4x1xf32> to vector<4x1xf32>
    %73 = tpu.concatenate %66, %64 in 1 : vector<4x32xf32>, vector<4x32xf32> -> vector<4x64xf32>
    %cst_33 = arith.constant dense<0.000000e+00> : vector<4x160xf32>
    %74 = tpu.matmul %73, %5, %cst_33 {dimension_numbers = #tpu.dot_dimension_numbers<[1], [0], [0], [1], [0, 0, 1, 1], [], []>} : vector<4x64xf32>, vector<64x160xf32>, vector<4x160xf32> -> vector<4x160xf32>
    %75 = vector.extract_strided_slice %74 {offsets = [0, 128], sizes = [4, 32], strides = [1, 1]} : vector<4x160xf32> to vector<4x32xf32>
    %76 = vector.broadcast %6 : vector<1x32xf32> to vector<4x32xf32>
    %77 = arith.addf %75, %76 : vector<4x32xf32>
    %78 = math.tanh %77 : vector<4x32xf32>
    %79 = vector.broadcast %72 : vector<4x1xf32> to vector<4x32xf32>
    %80 = arith.mulf %79, %78 : vector<4x32xf32>
    %81 = arith.addf %64, %80 : vector<4x32xf32>
    %82 = vector.extract_strided_slice %74 {offsets = [0, 0], sizes = [4, 128], strides = [1, 1]} : vector<4x160xf32> to vector<4x128xf32>
    %83 = arith.addf %70, %82 : vector<4x128xf32>
    %84 = arith.negf %83 : vector<4x128xf32>
    %85 = math.exp %84 : vector<4x128xf32>
    %cst_34 = arith.constant 1.000000e+00 : f32
    %86 = vector.broadcast %cst_34 : f32 to vector<4x128xf32>
    %87 = arith.addf %86, %85 : vector<4x128xf32>
    %88 = arith.divf %86, %87 : vector<4x128xf32>
    %89 = vector.extract_strided_slice %88 {offsets = [0, 0], sizes = [4, 32], strides = [1, 1]} : vector<4x128xf32> to vector<4x32xf32>
    %90 = vector.extract_strided_slice %88 {offsets = [0, 32], sizes = [4, 32], strides = [1, 1]} : vector<4x128xf32> to vector<4x32xf32>
    %91 = vector.extract_strided_slice %88 {offsets = [0, 64], sizes = [4, 32], strides = [1, 1]} : vector<4x128xf32> to vector<4x32xf32>
    %92 = vector.extract_strided_slice %88 {offsets = [0, 96], sizes = [4, 32], strides = [1, 1]} : vector<4x128xf32> to vector<4x32xf32>
    %93 = arith.mulf %90, %81 : vector<4x32xf32>
    %94 = arith.mulf %89, %92 : vector<4x32xf32>
    %95 = arith.addf %93, %94 : vector<4x32xf32>
    %96 = math.tanh %95 : vector<4x32xf32>
    %97 = arith.mulf %91, %96 : vector<4x32xf32>
    %98 = vector.shape_cast %97 : vector<4x32xf32> to vector<4x1x32xf32>
    %c0_35 = arith.constant 0 : index
    %c2_36 = arith.constant 2 : index
    %c0_37 = arith.constant 0 : index
    %99 = vector.load %arg5[%c0_35, %c2_36, %c0_37] : memref<4x8x32xf32, #tpu.memory_space<vmem>>, vector<4x1x32xf32>
    tpu.vector_store %arg5[%c0_35, %c2_36, %c0_37], %98 {strides = array<i32>} : memref<4x8x32xf32, #tpu.memory_space<vmem>>, vector<4x1x32xf32>,
    %c3 = arith.constant 3 : index
    %c0_38 = arith.constant 0 : index
    %c0_39 = arith.constant 0 : index
    %100 = vector.load %arg1[%c3, %c0_38, %c0_39] : memref<8x4x128xf32, #tpu.memory_space<vmem>>, vector<1x4x128xf32>
    %101 = vector.shape_cast %100 : vector<1x4x128xf32> to vector<4x128xf32>
    %c3_40 = arith.constant 3 : index
    %c0_41 = arith.constant 0 : index
    %c0_42 = arith.constant 0 : index
    %102 = vector.load %arg2[%c3_40, %c0_41, %c0_42] : memref<8x4x1xf32, #tpu.memory_space<vmem>>, vector<1x4x1xf32>
    %103 = vector.shape_cast %102 : vector<1x4x1xf32> to vector<4x1xf32>
    %104 = tpu.concatenate %97, %95 in 1 : vector<4x32xf32>, vector<4x32xf32> -> vector<4x64xf32>
    %cst_43 = arith.constant dense<0.000000e+00> : vector<4x160xf32>
    %105 = tpu.matmul %104, %5, %cst_43 {dimension_numbers = #tpu.dot_dimension_numbers<[1], [0], [0], [1], [0, 0, 1, 1], [], []>} : vector<4x64xf32>, vector<64x160xf32>, vector<4x160xf32> -> vector<4x160xf32>
    %106 = vector.extract_strided_slice %105 {offsets = [0, 128], sizes = [4, 32], strides = [1, 1]} : vector<4x160xf32> to vector<4x32xf32>
    %107 = vector.broadcast %6 : vector<1x32xf32> to vector<4x32xf32>
    %108 = arith.addf %106, %107 : vector<4x32xf32>
    %109 = math.tanh %108 : vector<4x32xf32>
    %110 = vector.broadcast %103 : vector<4x1xf32> to vector<4x32xf32>
    %111 = arith.mulf %110, %109 : vector<4x32xf32>
    %112 = arith.addf %95, %111 : vector<4x32xf32>
    %113 = vector.extract_strided_slice %105 {offsets = [0, 0], sizes = [4, 128], strides = [1, 1]} : vector<4x160xf32> to vector<4x128xf32>
    %114 = arith.addf %101, %113 : vector<4x128xf32>
    %115 = arith.negf %114 : vector<4x128xf32>
    %116 = math.exp %115 : vector<4x128xf32>
    %cst_44 = arith.constant 1.000000e+00 : f32
    %117 = vector.broadcast %cst_44 : f32 to vector<4x128xf32>
    %118 = arith.addf %117, %116 : vector<4x128xf32>
    %119 = arith.divf %117, %118 : vector<4x128xf32>
    %120 = vector.extract_strided_slice %119 {offsets = [0, 0], sizes = [4, 32], strides = [1, 1]} : vector<4x128xf32> to vector<4x32xf32>
    %121 = vector.extract_strided_slice %119 {offsets = [0, 32], sizes = [4, 32], strides = [1, 1]} : vector<4x128xf32> to vector<4x32xf32>
    %122 = vector.extract_strided_slice %119 {offsets = [0, 64], sizes = [4, 32], strides = [1, 1]} : vector<4x128xf32> to vector<4x32xf32>
    %123 = vector.extract_strided_slice %119 {offsets = [0, 96], sizes = [4, 32], strides = [1, 1]} : vector<4x128xf32> to vector<4x32xf32>
    %124 = arith.mulf %121, %112 : vector<4x32xf32>
    %125 = arith.mulf %120, %123 : vector<4x32xf32>
    %126 = arith.addf %124, %125 : vector<4x32xf32>
    %127 = math.tanh %126 : vector<4x32xf32>
    %128 = arith.mulf %122, %127 : vector<4x32xf32>
    %129 = vector.shape_cast %128 : vector<4x32xf32> to vector<4x1x32xf32>
    %c0_45 = arith.constant 0 : index
    %c3_46 = arith.constant 3 : index
    %c0_47 = arith.constant 0 : index
    %130 = vector.load %arg5[%c0_45, %c3_46, %c0_47] : memref<4x8x32xf32, #tpu.memory_space<vmem>>, vector<4x1x32xf32>
    tpu.vector_store %arg5[%c0_45, %c3_46, %c0_47], %129 {strides = array<i32>} : memref<4x8x32xf32, #tpu.memory_space<vmem>>, vector<4x1x32xf32>,
    %c4 = arith.constant 4 : index
    %c0_48 = arith.constant 0 : index
    %c0_49 = arith.constant 0 : index
    %131 = vector.load %arg1[%c4, %c0_48, %c0_49] : memref<8x4x128xf32, #tpu.memory_space<vmem>>, vector<1x4x128xf32>
    %132 = vector.shape_cast %131 : vector<1x4x128xf32> to vector<4x128xf32>
    %c4_50 = arith.constant 4 : index
    %c0_51 = arith.constant 0 : index
    %c0_52 = arith.constant 0 : index
    %133 = vector.load %arg2[%c4_50, %c0_51, %c0_52] : memref<8x4x1xf32, #tpu.memory_space<vmem>>, vector<1x4x1xf32>
    %134 = vector.shape_cast %133 : vector<1x4x1xf32> to vector<4x1xf32>
    %135 = tpu.concatenate %128, %126 in 1 : vector<4x32xf32>, vector<4x32xf32> -> vector<4x64xf32>
    %cst_53 = arith.constant dense<0.000000e+00> : vector<4x160xf32>
    %136 = tpu.matmul %135, %5, %cst_53 {dimension_numbers = #tpu.dot_dimension_numbers<[1], [0], [0], [1], [0, 0, 1, 1], [], []>} : vector<4x64xf32>, vector<64x160xf32>, vector<4x160xf32> -> vector<4x160xf32>
    %137 = vector.extract_strided_slice %136 {offsets = [0, 128], sizes = [4, 32], strides = [1, 1]} : vector<4x160xf32> to vector<4x32xf32>
    %138 = vector.broadcast %6 : vector<1x32xf32> to vector<4x32xf32>
    %139 = arith.addf %137, %138 : vector<4x32xf32>
    %140 = math.tanh %139 : vector<4x32xf32>
    %141 = vector.broadcast %134 : vector<4x1xf32> to vector<4x32xf32>
    %142 = arith.mulf %141, %140 : vector<4x32xf32>
    %143 = arith.addf %126, %142 : vector<4x32xf32>
    %144 = vector.extract_strided_slice %136 {offsets = [0, 0], sizes = [4, 128], strides = [1, 1]} : vector<4x160xf32> to vector<4x128xf32>
    %145 = arith.addf %132, %144 : vector<4x128xf32>
    %146 = arith.negf %145 : vector<4x128xf32>
    %147 = math.exp %146 : vector<4x128xf32>
    %cst_54 = arith.constant 1.000000e+00 : f32
    %148 = vector.broadcast %cst_54 : f32 to vector<4x128xf32>
    %149 = arith.addf %148, %147 : vector<4x128xf32>
    %150 = arith.divf %148, %149 : vector<4x128xf32>
    %151 = vector.extract_strided_slice %150 {offsets = [0, 0], sizes = [4, 32], strides = [1, 1]} : vector<4x128xf32> to vector<4x32xf32>
    %152 = vector.extract_strided_slice %150 {offsets = [0, 32], sizes = [4, 32], strides = [1, 1]} : vector<4x128xf32> to vector<4x32xf32>
    %153 = vector.extract_strided_slice %150 {offsets = [0, 64], sizes = [4, 32], strides = [1, 1]} : vector<4x128xf32> to vector<4x32xf32>
    %154 = vector.extract_strided_slice %150 {offsets = [0, 96], sizes = [4, 32], strides = [1, 1]} : vector<4x128xf32> to vector<4x32xf32>
    %155 = arith.mulf %152, %143 : vector<4x32xf32>
    %156 = arith.mulf %151, %154 : vector<4x32xf32>
    %157 = arith.addf %155, %156 : vector<4x32xf32>
    %158 = math.tanh %157 : vector<4x32xf32>
    %159 = arith.mulf %153, %158 : vector<4x32xf32>
    %160 = vector.shape_cast %159 : vector<4x32xf32> to vector<4x1x32xf32>
    %c0_55 = arith.constant 0 : index
    %c4_56 = arith.constant 4 : index
    %c0_57 = arith.constant 0 : index
    %161 = vector.load %arg5[%c0_55, %c4_56, %c0_57] : memref<4x8x32xf32, #tpu.memory_space<vmem>>, vector<4x1x32xf32>
    tpu.vector_store %arg5[%c0_55, %c4_56, %c0_57], %160 {strides = array<i32>} : memref<4x8x32xf32, #tpu.memory_space<vmem>>, vector<4x1x32xf32>,
    %c5 = arith.constant 5 : index
    %c0_58 = arith.constant 0 : index
    %c0_59 = arith.constant 0 : index
    %162 = vector.load %arg1[%c5, %c0_58, %c0_59] : memref<8x4x128xf32, #tpu.memory_space<vmem>>, vector<1x4x128xf32>
    %163 = vector.shape_cast %162 : vector<1x4x128xf32> to vector<4x128xf32>
    %c5_60 = arith.constant 5 : index
    %c0_61 = arith.constant 0 : index
    %c0_62 = arith.constant 0 : index
    %164 = vector.load %arg2[%c5_60, %c0_61, %c0_62] : memref<8x4x1xf32, #tpu.memory_space<vmem>>, vector<1x4x1xf32>
    %165 = vector.shape_cast %164 : vector<1x4x1xf32> to vector<4x1xf32>
    %166 = tpu.concatenate %159, %157 in 1 : vector<4x32xf32>, vector<4x32xf32> -> vector<4x64xf32>
    %cst_63 = arith.constant dense<0.000000e+00> : vector<4x160xf32>
    %167 = tpu.matmul %166, %5, %cst_63 {dimension_numbers = #tpu.dot_dimension_numbers<[1], [0], [0], [1], [0, 0, 1, 1], [], []>} : vector<4x64xf32>, vector<64x160xf32>, vector<4x160xf32> -> vector<4x160xf32>
    %168 = vector.extract_strided_slice %167 {offsets = [0, 128], sizes = [4, 32], strides = [1, 1]} : vector<4x160xf32> to vector<4x32xf32>
    %169 = vector.broadcast %6 : vector<1x32xf32> to vector<4x32xf32>
    %170 = arith.addf %168, %169 : vector<4x32xf32>
    %171 = math.tanh %170 : vector<4x32xf32>
    %172 = vector.broadcast %165 : vector<4x1xf32> to vector<4x32xf32>
    %173 = arith.mulf %172, %171 : vector<4x32xf32>
    %174 = arith.addf %157, %173 : vector<4x32xf32>
    %175 = vector.extract_strided_slice %167 {offsets = [0, 0], sizes = [4, 128], strides = [1, 1]} : vector<4x160xf32> to vector<4x128xf32>
    %176 = arith.addf %163, %175 : vector<4x128xf32>
    %177 = arith.negf %176 : vector<4x128xf32>
    %178 = math.exp %177 : vector<4x128xf32>
    %cst_64 = arith.constant 1.000000e+00 : f32
    %179 = vector.broadcast %cst_64 : f32 to vector<4x128xf32>
    %180 = arith.addf %179, %178 : vector<4x128xf32>
    %181 = arith.divf %179, %180 : vector<4x128xf32>
    %182 = vector.extract_strided_slice %181 {offsets = [0, 0], sizes = [4, 32], strides = [1, 1]} : vector<4x128xf32> to vector<4x32xf32>
    %183 = vector.extract_strided_slice %181 {offsets = [0, 32], sizes = [4, 32], strides = [1, 1]} : vector<4x128xf32> to vector<4x32xf32>
    %184 = vector.extract_strided_slice %181 {offsets = [0, 64], sizes = [4, 32], strides = [1, 1]} : vector<4x128xf32> to vector<4x32xf32>
    %185 = vector.extract_strided_slice %181 {offsets = [0, 96], sizes = [4, 32], strides = [1, 1]} : vector<4x128xf32> to vector<4x32xf32>
    %186 = arith.mulf %183, %174 : vector<4x32xf32>
    %187 = arith.mulf %182, %185 : vector<4x32xf32>
    %188 = arith.addf %186, %187 : vector<4x32xf32>
    %189 = math.tanh %188 : vector<4x32xf32>
    %190 = arith.mulf %184, %189 : vector<4x32xf32>
    %191 = vector.shape_cast %190 : vector<4x32xf32> to vector<4x1x32xf32>
    %c0_65 = arith.constant 0 : index
    %c5_66 = arith.constant 5 : index
    %c0_67 = arith.constant 0 : index
    %192 = vector.load %arg5[%c0_65, %c5_66, %c0_67] : memref<4x8x32xf32, #tpu.memory_space<vmem>>, vector<4x1x32xf32>
    tpu.vector_store %arg5[%c0_65, %c5_66, %c0_67], %191 {strides = array<i32>} : memref<4x8x32xf32, #tpu.memory_space<vmem>>, vector<4x1x32xf32>,
    %c6 = arith.constant 6 : index
    %c0_68 = arith.constant 0 : index
    %c0_69 = arith.constant 0 : index
    %193 = vector.load %arg1[%c6, %c0_68, %c0_69] : memref<8x4x128xf32, #tpu.memory_space<vmem>>, vector<1x4x128xf32>
    %194 = vector.shape_cast %193 : vector<1x4x128xf32> to vector<4x128xf32>
    %c6_70 = arith.constant 6 : index
    %c0_71 = arith.constant 0 : index
    %c0_72 = arith.constant 0 : index
    %195 = vector.load %arg2[%c6_70, %c0_71, %c0_72] : memref<8x4x1xf32, #tpu.memory_space<vmem>>, vector<1x4x1xf32>
    %196 = vector.shape_cast %195 : vector<1x4x1xf32> to vector<4x1xf32>
    %197 = tpu.concatenate %190, %188 in 1 : vector<4x32xf32>, vector<4x32xf32> -> vector<4x64xf32>
    %cst_73 = arith.constant dense<0.000000e+00> : vector<4x160xf32>
    %198 = tpu.matmul %197, %5, %cst_73 {dimension_numbers = #tpu.dot_dimension_numbers<[1], [0], [0], [1], [0, 0, 1, 1], [], []>} : vector<4x64xf32>, vector<64x160xf32>, vector<4x160xf32> -> vector<4x160xf32>
    %199 = vector.extract_strided_slice %198 {offsets = [0, 128], sizes = [4, 32], strides = [1, 1]} : vector<4x160xf32> to vector<4x32xf32>
    %200 = vector.broadcast %6 : vector<1x32xf32> to vector<4x32xf32>
    %201 = arith.addf %199, %200 : vector<4x32xf32>
    %202 = math.tanh %201 : vector<4x32xf32>
    %203 = vector.broadcast %196 : vector<4x1xf32> to vector<4x32xf32>
    %204 = arith.mulf %203, %202 : vector<4x32xf32>
    %205 = arith.addf %188, %204 : vector<4x32xf32>
    %206 = vector.extract_strided_slice %198 {offsets = [0, 0], sizes = [4, 128], strides = [1, 1]} : vector<4x160xf32> to vector<4x128xf32>
    %207 = arith.addf %194, %206 : vector<4x128xf32>
    %208 = arith.negf %207 : vector<4x128xf32>
    %209 = math.exp %208 : vector<4x128xf32>
    %cst_74 = arith.constant 1.000000e+00 : f32
    %210 = vector.broadcast %cst_74 : f32 to vector<4x128xf32>
    %211 = arith.addf %210, %209 : vector<4x128xf32>
    %212 = arith.divf %210, %211 : vector<4x128xf32>
    %213 = vector.extract_strided_slice %212 {offsets = [0, 0], sizes = [4, 32], strides = [1, 1]} : vector<4x128xf32> to vector<4x32xf32>
    %214 = vector.extract_strided_slice %212 {offsets = [0, 32], sizes = [4, 32], strides = [1, 1]} : vector<4x128xf32> to vector<4x32xf32>
    %215 = vector.extract_strided_slice %212 {offsets = [0, 64], sizes = [4, 32], strides = [1, 1]} : vector<4x128xf32> to vector<4x32xf32>
    %216 = vector.extract_strided_slice %212 {offsets = [0, 96], sizes = [4, 32], strides = [1, 1]} : vector<4x128xf32> to vector<4x32xf32>
    %217 = arith.mulf %214, %205 : vector<4x32xf32>
    %218 = arith.mulf %213, %216 : vector<4x32xf32>
    %219 = arith.addf %217, %218 : vector<4x32xf32>
    %220 = math.tanh %219 : vector<4x32xf32>
    %221 = arith.mulf %215, %220 : vector<4x32xf32>
    %222 = vector.shape_cast %221 : vector<4x32xf32> to vector<4x1x32xf32>
    %c0_75 = arith.constant 0 : index
    %c6_76 = arith.constant 6 : index
    %c0_77 = arith.constant 0 : index
    %223 = vector.load %arg5[%c0_75, %c6_76, %c0_77] : memref<4x8x32xf32, #tpu.memory_space<vmem>>, vector<4x1x32xf32>
    tpu.vector_store %arg5[%c0_75, %c6_76, %c0_77], %222 {strides = array<i32>} : memref<4x8x32xf32, #tpu.memory_space<vmem>>, vector<4x1x32xf32>,
    %c7 = arith.constant 7 : index
    %c0_78 = arith.constant 0 : index
    %c0_79 = arith.constant 0 : index
    %224 = vector.load %arg1[%c7, %c0_78, %c0_79] : memref<8x4x128xf32, #tpu.memory_space<vmem>>, vector<1x4x128xf32>
    %225 = vector.shape_cast %224 : vector<1x4x128xf32> to vector<4x128xf32>
    %c7_80 = arith.constant 7 : index
    %c0_81 = arith.constant 0 : index
    %c0_82 = arith.constant 0 : index
    %226 = vector.load %arg2[%c7_80, %c0_81, %c0_82] : memref<8x4x1xf32, #tpu.memory_space<vmem>>, vector<1x4x1xf32>
    %227 = vector.shape_cast %226 : vector<1x4x1xf32> to vector<4x1xf32>
    %228 = tpu.concatenate %221, %219 in 1 : vector<4x32xf32>, vector<4x32xf32> -> vector<4x64xf32>
    %cst_83 = arith.constant dense<0.000000e+00> : vector<4x160xf32>
    %229 = tpu.matmul %228, %5, %cst_83 {dimension_numbers = #tpu.dot_dimension_numbers<[1], [0], [0], [1], [0, 0, 1, 1], [], []>} : vector<4x64xf32>, vector<64x160xf32>, vector<4x160xf32> -> vector<4x160xf32>
    %230 = vector.extract_strided_slice %229 {offsets = [0, 128], sizes = [4, 32], strides = [1, 1]} : vector<4x160xf32> to vector<4x32xf32>
    %231 = vector.broadcast %6 : vector<1x32xf32> to vector<4x32xf32>
    %232 = arith.addf %230, %231 : vector<4x32xf32>
    %233 = math.tanh %232 : vector<4x32xf32>
    %234 = vector.broadcast %227 : vector<4x1xf32> to vector<4x32xf32>
    %235 = arith.mulf %234, %233 : vector<4x32xf32>
    %236 = arith.addf %219, %235 : vector<4x32xf32>
    %237 = vector.extract_strided_slice %229 {offsets = [0, 0], sizes = [4, 128], strides = [1, 1]} : vector<4x160xf32> to vector<4x128xf32>
    %238 = arith.addf %225, %237 : vector<4x128xf32>
    %239 = arith.negf %238 : vector<4x128xf32>
    %240 = math.exp %239 : vector<4x128xf32>
    %cst_84 = arith.constant 1.000000e+00 : f32
    %241 = vector.broadcast %cst_84 : f32 to vector<4x128xf32>
    %242 = arith.addf %241, %240 : vector<4x128xf32>
    %243 = arith.divf %241, %242 : vector<4x128xf32>
    %244 = vector.extract_strided_slice %243 {offsets = [0, 0], sizes = [4, 32], strides = [1, 1]} : vector<4x128xf32> to vector<4x32xf32>
    %245 = vector.extract_strided_slice %243 {offsets = [0, 32], sizes = [4, 32], strides = [1, 1]} : vector<4x128xf32> to vector<4x32xf32>
    %246 = vector.extract_strided_slice %243 {offsets = [0, 64], sizes = [4, 32], strides = [1, 1]} : vector<4x128xf32> to vector<4x32xf32>
    %247 = vector.extract_strided_slice %243 {offsets = [0, 96], sizes = [4, 32], strides = [1, 1]} : vector<4x128xf32> to vector<4x32xf32>
    %248 = arith.mulf %245, %236 : vector<4x32xf32>
    %249 = arith.mulf %244, %247 : vector<4x32xf32>
    %250 = arith.addf %248, %249 : vector<4x32xf32>
    %251 = math.tanh %250 : vector<4x32xf32>
    %252 = arith.mulf %246, %251 : vector<4x32xf32>
    %253 = vector.shape_cast %252 : vector<4x32xf32> to vector<4x1x32xf32>
    %c0_85 = arith.constant 0 : index
    %c7_86 = arith.constant 7 : index
    %c0_87 = arith.constant 0 : index
    %254 = vector.load %arg5[%c0_85, %c7_86, %c0_87] : memref<4x8x32xf32, #tpu.memory_space<vmem>>, vector<4x1x32xf32>
    tpu.vector_store %arg5[%c0_85, %c7_86, %c0_87], %253 {strides = array<i32>} : memref<4x8x32xf32, #tpu.memory_space<vmem>>, vector<4x1x32xf32>,
    %c0_88 = arith.constant 0 : index
    %c0_89 = arith.constant 0 : index
    %255 = vector.load %arg8[%c0_88, %c0_89] : memref<4x32xf32, #tpu.memory_space<vmem>>, vector<4x32xf32>
    tpu.vector_store %arg8[%c0_88, %c0_89], %252 {strides = array<i32>} : memref<4x32xf32, #tpu.memory_space<vmem>>, vector<4x32xf32>,
    %c0_90 = arith.constant 0 : index
    %c0_91 = arith.constant 0 : index
    %256 = vector.load %arg9[%c0_90, %c0_91] : memref<4x32xf32, #tpu.memory_space<vmem>>, vector<4x32xf32>
    tpu.vector_store %arg9[%c0_90, %c0_91], %250 {strides = array<i32>} : memref<4x32xf32, #tpu.memory_space<vmem>>, vector<4x32xf32>,
    %c0_i32_92 = arith.constant 0 : i32
    %257 = arith.cmpi eq, %arg0, %c0_i32_92 : i32
    %258 = arith.extui %257 : i1 to i32
    %c0_i32_93 = arith.constant 0 : i32
    %259 = arith.cmpi ne, %258, %c0_i32_93 : i32
    scf.if %259 {
      %c0_94 = arith.constant 0 : index
      %c0_95 = arith.constant 0 : index
      %260 = vector.load %arg6[%c0_94, %c0_95] : memref<4x32xf32, #tpu.memory_space<vmem>>, vector<4x32xf32>
      tpu.vector_store %arg6[%c0_94, %c0_95], %250 {strides = array<i32>} : memref<4x32xf32, #tpu.memory_space<vmem>>, vector<4x32xf32>,
    } else {
    }
    return
  }
  func.func @transform_0(%arg0: i32) -> (i32, i32, i32) {
    %c0_i32 = arith.constant 0 : i32
    %c0_i32_0 = arith.constant 0 : i32
    %c0_i32_1 = arith.constant 0 : i32
    return %arg0, %c0_i32, %c0_i32_0 : i32, i32, i32
  }
  func.func @transform_1(%arg0: i32) -> (i32, i32, i32) {
    %c0_i32 = arith.constant 0 : i32
    %c0_i32_0 = arith.constant 0 : i32
    %c0_i32_1 = arith.constant 0 : i32
    return %arg0, %c0_i32, %c0_i32_0 : i32, i32, i32
  }
  func.func @transform_3(%arg0: i32) -> (i32, i32) {
    %c0_i32 = arith.constant 0 : i32
    %c0_i32_0 = arith.constant 0 : i32
    %c0_i32_1 = arith.constant 0 : i32
    return %c0_i32, %c0_i32_0 : i32, i32
  }
  func.func @transform_4(%arg0: i32) -> (i32, i32, i32) {
    %c0_i32 = arith.constant 0 : i32
    %c0_i32_0 = arith.constant 0 : i32
    %c0_i32_1 = arith.constant 0 : i32
    return %c0_i32, %arg0, %c0_i32_0 : i32, i32, i32
  }
  func.func @transform_5(%arg0: i32) -> (i32, i32) {
    %c0_i32 = arith.constant 0 : i32
    %c0_i32_0 = arith.constant 0 : i32
    %c0_i32_1 = arith.constant 0 : i32
    return %c0_i32, %c0_i32_0 : i32, i32
  }
}

</mosaic_0001>

<bundles_post_ra>
// kernel: reverse
= control target key start
LH: loop header
LB: loop body
LE: loop exit
PB: predicated region body
PF: predicated region fallthrough
CT: control target
= control target key end

     0   :  { %v2_v0 = vlaneseq  ;;  %s105_s0 = inlined_call_operand.vmem [shape: f32[7,2,1], index: 0, kind: input, shape index: {}]   ;;  %s106_s1 = inlined_call_operand.vmem [shape: f32[7,2,1], index: 1, kind: output, shape index: {}]  }
   0x2   :  { %v3_v1 = vsub.s32 6, %v2_v0 }
   0x4   :  { %4 = vset.pattern.permute.xlu0 %v3_v1 }
   0x5   :  { %v20_v2 = vld [vmem:[%s105_s0] sm:$0x3] }
   0x6   :  { %21 = vst [vmem:[#allocation1] sm:$0x3] %v20_v2 }
   0xd   :  { %v38_v3 = vld [vmem:[#allocation1] sm:$0x3] }
   0xe   :  { %39 = vst [vmem:[#allocation0] sm:$0x3] %v38_v3 }
  0x15   :  { %v40_v4 = vld [vmem:[#allocation0] sm:$0xff] }
  0x16   :  { %41 = vperm.xlu0 %4, %v40_v4  }
  0x95   :  { %v42_v5 = vpop.permute.xlu0 %41 }
  0x96   :  { %43 = vst [vmem:[#allocation2] sm:$0xff] %v42_v5 }
  0x9d   :  { %v47_v6 = vld [vmem:[#allocation2] sm:$0x3] }
  0x9e   :  { %49 = vst [vmem:[#allocation3] sm:$0x3] %v47_v6 }
  0xa5   :  { %v65_v7 = vld [vmem:[#allocation3] sm:$0x3] }
  0xa6   :  { %66 = vst [vmem:[%s106_s1] sm:$0x3] %v65_v7 }

// kernel: ftlstm_forward.1
= control target key start
LH: loop header
LB: loop body
LE: loop exit
PB: predicated region body
PF: predicated region fallthrough
CT: control target
= control target key end

     0   :  { %s2402_s0 = inlined_call_operand.vmem [shape: f32[8,4,128], index: 0, kind: input, shape index: {}]   ;;  %s2403_s1 = inlined_call_operand.vmem [shape: f32[8,4,1], index: 1, kind: input, shape index: {}]   ;;  %s2404_s2 = inlined_call_operand.vmem [shape: f32[64,160], index: 2, kind: input, shape index: {}]   ;;  %s2405_s3 = inlined_call_operand.vmem [shape: f32[1,32], index: 3, kind: input, shape index: {}]   ;;  %s2406_s4 = inlined_call_operand.vmem [shape: f32[4,8,32], index: 4, kind: output, shape index: {0}]   ;;  %s2407_s5 = inlined_call_operand.vmem [shape: f32[4,32], index: 5, kind: output, shape index: {1}]  }
   0x1   :  { %v53_v0 = vld [vmem:[%s2404_s2] sm:$0xff]  ;;  %v55_v1 = vld [vmem:[%s2404_s2 + $0x8] sm:$0xff]  ;;  %v57_v2 = vld [vmem:[%s2404_s2 + $0x10] sm:$0xff] }
   0x2   :  { %v59_v3 = vld [vmem:[%s2404_s2 + $0x18] sm:$0xff]  ;;  %v61_v4 = vld [vmem:[%s2404_s2 + $0x20] sm:$0xff]  ;;  %v63_v5 = vld [vmem:[%s2404_s2 + $0x28] sm:$0xff] }
   0x3   :  { %v65_v6 = vld [vmem:[%s2404_s2 + $0x30] sm:$0xff]  ;;  %v67_v7 = vld [vmem:[%s2404_s2 + $0x38] sm:$0xff]  ;;  %v69_v8 = vld [vmem:[%s2404_s2 + $0x40] sm:$0xff] }
   0x4   :  { %v71_v9 = vld [vmem:[%s2404_s2 + $0x48] sm:$0xff]  ;;  %v73_v10 = vld [vmem:[%s2404_s2 + $0x50] sm:$0xff]  ;;  %v75_v11 = vld [vmem:[%s2404_s2 + $0x58] sm:$0xff] }
   0x5   :  { %v77_v12 = vld [vmem:[%s2404_s2 + $0x60] sm:$0xff]  ;;  %v79_v13 = vld [vmem:[%s2404_s2 + $0x68] sm:$0xff]  ;;  %v81_v14 = vld [vmem:[%s2404_s2 + $0x70] sm:$0xff] }
   0x6   :  { %v83_v15 = vld [vmem:[%s2404_s2 + $0x78] sm:$0xff] }
   0x7   :  { %92 = vsyncadd [#allocation5], 2048 }
   0x8   :  { %1802 = dma.done.wait [#allocation5], 2048 }
   0x9   :  { %1803 = vsyncadd [#allocation5], 4294965248  ;;  %vm97_vm0 = vcmask 257024   ;;  %v1888_v16 = vpack.c.bf16 %v59_v3, %v55_v1  ;;  %v1890_v17 = vpack.c.bf16 %v57_v2, %v53_v0  ;;  %v1804_v18 = vmov 0.0   ;;  %s1806_s2 = smov 32   ;;  %s1807_s7 = smov 64  }
   0xa   :  { %99 = vst.msk [vmem:[#allocation4] sm:$0xf] %vm97_vm0, %v1804_v18  ;;  %98 = vst.msk [vmem:[#allocation3] sm:$0xf] %vm97_vm0, %v1804_v18  ;;  %v1896_v19 = vpack.c.bf16 %v67_v7, %v63_v5  ;;  %195 = vmatprep.mubr.f32.mxu0 %v1804_v18  ;;  %v1902_v20 = vpack.c.bf16 %v65_v6, %v61_v4  ;;  %v1906_v21 = vpack.c.bf16 %v75_v11, %v71_v9  ;;  %v1805_v22 = vmov 0  }
   0xb   :  { %1604 = vmatprep.subr.bf16.mxu0 %v1888_v16  ;;  %1620 = vmatprep.subr.bf16.mxu1 %v1888_v16  ;;  %v1911_v23 = vpack.c.bf16 %v73_v10, %v69_v8  ;;  %v1915_v25 = vpack.c.bf16 %v83_v15, %v79_v13  ;;  %v120_v26 = vld [vmem:[%s2403_s1] sm:$0xf]  ;;  %v1923_v27 = vpack.c.bf16 %v81_v14, %v77_v12  ;;  %vm125_vm1 = vcmask 261120   ;;  %v1575_v52 = vld [vmem:[%s2403_s1 + $0x4] sm:$0xf] }
   0xc   :  { %1606 = vmatpush1.bf16.msra.mxu0 %v1890_v17  ;;  %1622 = vmatpush1.bf16.msra.mxu1 %v1890_v17  ;;  %vm127_vm2 = vcmask 523264   ;;  %v119_v31 = vld [vmem:[%s2402_s0] sm:$0xf]  ;;  %v1574_v57 = vld [vmem:[%s2402_s0 + $0x4] sm:$0xf]  ;;  %vm298_vm3 = vcmask 253952  }
   0xd   :  { %1608 = vmatprep.subr.bf16.mxu0 %v1896_v19  ;;  %1737 = vset.pattern.permute.xlu0 %v1805_v22  ;;  %v1949_v36 = vld [vmem:[%s2405_s3] ss:$0 sm:$0xff]  ;;  %v1579_v13 = vld [vmem:[%s2403_s1 + $0x8] sm:$0xf] }
   0xe   :  { %1624 = vmatprep.subr.bf16.mxu1 %v1896_v19  ;;  %378 = vmatprep.mubr.f32.mxu1 %v1804_v18 }
  0x10   :  { %1610 = vmatpush1.bf16.msra.mxu0 %v1902_v20  ;;  %1626 = vmatpush1.bf16.msra.mxu1 %v1902_v20 }
  0x11   :  { %v101_v24 = vld [vmem:[#allocation4] sm:$0xf]  ;;  %1612 = vmatprep.subr.bf16.mxu0 %v1906_v21  ;;  %1628 = vmatprep.subr.bf16.mxu1 %v1906_v21  ;;  %v100_v28 = vld [vmem:[#allocation3] sm:$0xf] }
  0x12   :  { %122 = vrot.lane.b32.xlu0 %v101_v24, %s1806_s2 }
  0x14   :  { %1614 = vmatpush1.bf16.msra.mxu0 %v1911_v23  ;;  %1630 = vmatpush1.bf16.msra.mxu1 %v1911_v23 }
  0x15   :  { %1616 = vmatprep.subr.bf16.mxu0 %v1915_v25  ;;  %1632 = vmatprep.subr.bf16.mxu1 %v1915_v25 }
  0x16   :  { %212 = vperm.xlu0 %1737, %v120_v26   ;;  %v1578_v26 = vld [vmem:[%s2402_s0 + $0x8] sm:$0xf] }
  0x18   :  { %1618 = vmatpush1.bf16.msra.mxu0 %v1923_v27  ;;  %1634 = vmatpush1.bf16.msra.mxu1 %v1923_v27 }
  0x19   :  { %1636 = vmatprep.subr.bf16.mxu0 %v1888_v16  ;;  %1652 = vmatprep.subr.bf16.mxu1 %v1888_v16 }
  0x84   :  { %v123_v29 = vpop.permute.xlu0 %122 }
  0x85   :  { %v126_v30 = vsel %vm125_vm1, %v100_v28, %v123_v29 }
  0x86   :  { %1571 = vmatmul.mubr.msk.f32.vlgmr.msra.gmra.mrb[0].mxu0 %vm127_vm2, %v126_v30 }
  0x87   :  { %1638 = vmatpush1.bf16.msra.mxu0 %v1890_v17  ;;  %554 = vmatprep.mubr.f32.mxu0 %v1804_v18 }
  0x88   :  { %1640 = vmatprep.subr.bf16.mxu0 %v1896_v19 }
  0x8b   :  { %1642 = vmatpush1.bf16.msra.mxu0 %v1902_v20 }
  0x8c   :  { %1644 = vmatprep.subr.bf16.mxu0 %v1906_v21 }
  0x8f   :  { %1646 = vmatpush1.bf16.msra.mxu0 %v1911_v23 }
  0x90   :  { %1648 = vmatprep.subr.bf16.mxu0 %v1915_v25 }
  0x93   :  { %1650 = vmatpush1.bf16.msra.mxu0 %v1923_v27 }
  0x94   :  { %1668 = vmatprep.subr.bf16.mxu0 %v1888_v16 }
  0x95   :  { %v213_v41 = vpop.permute.xlu0 %212 }
 0x159   :  { %v197_v32 = vpop.f32.mrb[0].mxu0 }
 0x15a   :  { %v217_v33 = vadd.f32 %v197_v32, %v119_v31  ;;  %v199_v34 = vpop.f32.mrb[1].mxu0 }
 0x15b   :  { %v208_v37 = vadd.f32 %v1949_v36, %v199_v34 }
 0x15c   :  { %v1573_v35 = vmul.f32 -1.442695, %v217_v33 }
 0x15e   :  { %1738 = vpow2.f32 %v1573_v35 }
 0x15f   :  { %1740 = vtanh.f32 %v208_v37 }
 0x168   :  { %v1739_v38 = vpop.eup %1738 }
 0x169   :  { %v221_v39 = vadd.f32 1.0, %v1739_v38  ;;  %v1741_v40 = vpop.eup %1740 }
 0x16a   :  { %v215_v42 = vmul.f32 %v1741_v40, %v213_v41 }
 0x16b   :  { %1742 = vrcp.f32 %v221_v39 }
 0x16c   :  { %v216_v44 = vadd.f32 %v215_v42, %v101_v24 }
 0x175   :  { %v1743_v43 = vpop.eup %1742 }
 0x176   :  { %230 = vrot.lane.b32.xlu1 %v1743_v43, %s1806_s2 }
 0x17a   :  { %225 = vrot.lane.b32.xlu1 %v216_v44, %s1806_s2 }
 0x1e8   :  { %v231_v45 = vpop.permute.xlu1 %230 }
 0x1e9   :  { %v233_v46 = vmul.f32 %v1743_v43, %v231_v45 }
 0x1eb   :  { %235 = vrot.lane.b32.xlu1 %v233_v46, %s1806_s2 }
 0x1ec   :  { %v226_v47 = vpop.permute.xlu1 %225 }
 0x1ed   :  { %v228_v48 = vmul.f32 %v1743_v43, %v226_v47 }
 0x25d   :  { %v236_v49 = vpop.permute.xlu1 %235 }
 0x25e   :  { %v238_v50 = vadd.f32 %v236_v49, %v228_v48  ;;  %v1583_v48 = vld [vmem:[%s2403_s1 + $0xc] sm:$0xf] }
 0x260   :  { %1744 = vtanh.f32 %v238_v50 }
 0x26a   :  { %v1745_v51 = vpop.eup %1744 }
 0x26b   :  { %241 = vrot.lane.b32.xlu0 %v1745_v51, %s1806_s2 }
 0x26f   :  { %389 = vperm.xlu0 %1737, %v1575_v52  }
 0x2dd   :  { %v242_v53 = vpop.permute.xlu0 %241 }
 0x2de   :  { %v1959_v54 = vmul.f32 %v1743_v43, %v242_v53  ;;  %v1582_v53 = vld [vmem:[%s2402_s0 + $0xc] sm:$0xf] }
 0x2e0   :  { %307 = vrot.lane.b32.xlu1 %v1959_v54, %s1807_s7 }
 0x2ee   :  { %v390_v0 = vpop.permute.xlu0 %389 }
 0x352   :  { %v308_v55 = vpop.permute.xlu1 %307 }
 0x353   :  { %v310_v56 = vsel %vm125_vm1, %v308_v55, %v238_v50 }
 0x354   :  { %1576 = vmatmul.mubr.msk.f32.vlgmr.msra.gmra.mrb[0].mxu1 %vm127_vm2, %v310_v56 }
 0x355   :  { %1654 = vmatpush1.bf16.msra.mxu1 %v1890_v17  ;;  %730 = vmatprep.mubr.f32.mxu1 %v1804_v18 }
 0x356   :  { %1656 = vmatprep.subr.bf16.mxu1 %v1896_v19 }
 0x359   :  { %1658 = vmatpush1.bf16.msra.mxu1 %v1902_v20 }
 0x35a   :  { %1660 = vmatprep.subr.bf16.mxu1 %v1906_v21 }
 0x35d   :  { %1662 = vmatpush1.bf16.msra.mxu1 %v1911_v23 }
 0x35e   :  { %1664 = vmatprep.subr.bf16.mxu1 %v1915_v25 }
 0x361   :  { %1666 = vmatpush1.bf16.msra.mxu1 %v1923_v27 }
 0x362   :  { %1684 = vmatprep.subr.bf16.mxu1 %v1888_v16 }
 0x427   :  { %v380_v58 = vpop.f32.mrb[0].mxu1 }
 0x428   :  { %v398_v59 = vadd.f32 %v1574_v57, %v380_v58  ;;  %v382_v60 = vpop.f32.mrb[1].mxu1 }
 0x429   :  { %v385_v61 = vadd.f32 %v1949_v36, %v382_v60 }
 0x42a   :  { %v1577_v62 = vmul.f32 -1.442695, %v398_v59 }
 0x42b   :  { %1746 = vtanh.f32 %v385_v61 }
 0x42c   :  { %1748 = vpow2.f32 %v1577_v62 }
 0x435   :  { %v1747_v63 = vpop.eup %1746 }
 0x436   :  { %v1749_v1 = vpop.eup %1748  ;;  %v392_v2 = vmul.f32 %v1747_v63, %v390_v0 }
 0x437   :  { %v402_v3 = vadd.f32 1.0, %v1749_v1 }
 0x438   :  { %394 = vrot.lane.b32.xlu0 %v392_v2, %s1806_s2 }
 0x439   :  { %1750 = vrcp.f32 %v402_v3 }
 0x443   :  { %v1751_v4 = vpop.eup %1750 }
 0x444   :  { %407 = vrot.lane.b32.xlu1 %v1751_v4, %s1806_s2 }
 0x4aa   :  { %v395_v7 = vpop.permute.xlu0 %394 }
 0x4ab   :  { %v397_v8 = vadd.f32 %v395_v7, %v238_v50 }
 0x4ad   :  { %v405_v9 = vmul.f32 %v1751_v4, %v397_v8 }
 0x4b6   :  { %v408_v5 = vpop.permute.xlu1 %407 }
 0x4b7   :  { %v410_v6 = vmul.f32 %v1751_v4, %v408_v5 }
 0x4b9   :  { %412 = vrot.lane.b32.xlu1 %v410_v6, %s1806_s2 }
 0x52b   :  { %v413_v10 = vpop.permute.xlu1 %412 }
 0x52c   :  { %v415_v11 = vadd.f32 %v413_v10, %v405_v9  ;;  %v1587_v9 = vld [vmem:[%s2403_s1 + $0x10] sm:$0xf] }
 0x52e   :  { %1752 = vtanh.f32 %v415_v11 }
 0x538   :  { %v1753_v12 = vpop.eup %1752 }
 0x539   :  { %418 = vrot.lane.b32.xlu0 %v1753_v12, %s1806_s2 }
 0x53d   :  { %565 = vperm.xlu0 %1737, %v1579_v13  }
 0x5ab   :  { %v419_v14 = vpop.permute.xlu0 %418 }
 0x5ac   :  { %v1985_v15 = vmul.f32 %v1751_v4, %v419_v14  ;;  %v1586_v14 = vld [vmem:[%s2402_s0 + $0x10] sm:$0xf] }
 0x5ae   :  { %483 = vrot.lane.b32.xlu1 %v1985_v15, %s1807_s7 }
 0x5bc   :  { %v566_v34 = vpop.permute.xlu0 %565 }
 0x620   :  { %v484_v22 = vpop.permute.xlu1 %483 }
 0x621   :  { %v486_v24 = vsel %vm125_vm1, %v484_v22, %v415_v11 }
 0x622   :  { %1580 = vmatmul.mubr.msk.f32.vlgmr.msra.gmra.mrb[2].mxu0 %vm127_vm2, %v486_v24 }
 0x623   :  { %1670 = vmatpush1.bf16.msra.mxu0 %v1890_v17  ;;  %906 = vmatprep.mubr.f32.mxu0 %v1804_v18 }
 0x624   :  { %1672 = vmatprep.subr.bf16.mxu0 %v1896_v19 }
 0x627   :  { %1674 = vmatpush1.bf16.msra.mxu0 %v1902_v20 }
 0x628   :  { %1676 = vmatprep.subr.bf16.mxu0 %v1906_v21 }
 0x62b   :  { %1678 = vmatpush1.bf16.msra.mxu0 %v1911_v23 }
 0x62c   :  { %1680 = vmatprep.subr.bf16.mxu0 %v1915_v25 }
 0x62f   :  { %1682 = vmatpush1.bf16.msra.mxu0 %v1923_v27 }
 0x630   :  { %1700 = vmatprep.subr.bf16.mxu0 %v1888_v16 }
 0x6f5   :  { %v556_v28 = vpop.f32.mrb[2].mxu0 }
 0x6f6   :  { %v574_v29 = vadd.f32 %v1578_v26, %v556_v28  ;;  %v558_v30 = vpop.f32.mrb[3].mxu0 }
 0x6f7   :  { %v561_v31 = vadd.f32 %v1949_v36, %v558_v30 }
 0x6f8   :  { %v1581_v32 = vmul.f32 -1.442695, %v574_v29 }
 0x6f9   :  { %1754 = vtanh.f32 %v561_v31 }
 0x6fa   :  { %1756 = vpow2.f32 %v1581_v32 }
 0x703   :  { %v1755_v33 = vpop.eup %1754 }
 0x704   :  { %v1757_v35 = vpop.eup %1756  ;;  %v568_v37 = vmul.f32 %v1755_v33, %v566_v34 }
 0x705   :  { %v578_v38 = vadd.f32 1.0, %v1757_v35 }
 0x706   :  { %570 = vrot.lane.b32.xlu0 %v568_v37, %s1806_s2 }
 0x707   :  { %1758 = vrcp.f32 %v578_v38 }
 0x711   :  { %v1759_v39 = vpop.eup %1758 }
 0x712   :  { %583 = vrot.lane.b32.xlu1 %v1759_v39, %s1806_s2 }
 0x778   :  { %v571_v42 = vpop.permute.xlu0 %570 }
 0x779   :  { %v573_v43 = vadd.f32 %v571_v42, %v415_v11 }
 0x77b   :  { %v581_v44 = vmul.f32 %v1759_v39, %v573_v43 }
 0x784   :  { %v584_v40 = vpop.permute.xlu1 %583 }
 0x785   :  { %v586_v41 = vmul.f32 %v1759_v39, %v584_v40 }
 0x787   :  { %588 = vrot.lane.b32.xlu1 %v586_v41, %s1806_s2 }
 0x7f9   :  { %v589_v45 = vpop.permute.xlu1 %588 }
 0x7fa   :  { %v591_v46 = vadd.f32 %v589_v45, %v581_v44  ;;  %v1591_v45 = vld [vmem:[%s2403_s1 + $0x14] sm:$0xf] }
 0x7fc   :  { %1760 = vtanh.f32 %v591_v46 }
 0x806   :  { %v1761_v47 = vpop.eup %1760 }
 0x807   :  { %594 = vrot.lane.b32.xlu0 %v1761_v47, %s1806_s2 }
 0x80b   :  { %741 = vperm.xlu0 %1737, %v1583_v48  }
 0x879   :  { %v595_v49 = vpop.permute.xlu0 %594 }
 0x87a   :  { %v2011_v50 = vmul.f32 %v1759_v39, %v595_v49 }
 0x87c   :  { %659 = vrot.lane.b32.xlu1 %v2011_v50, %s1807_s7 }
 0x88a   :  { %v742_v61 = vpop.permute.xlu0 %741 }
 0x8ee   :  { %v660_v51 = vpop.permute.xlu1 %659 }
 0x8ef   :  { %v662_v52 = vsel %vm125_vm1, %v660_v51, %v591_v46  ;;  %v1590_v51 = vld [vmem:[%s2402_s0 + $0x14] sm:$0xf] }
 0x8f0   :  { %1584 = vmatmul.mubr.msk.f32.vlgmr.msra.gmra.mrb[2].mxu1 %vm127_vm2, %v662_v52 }
 0x8f1   :  { %1686 = vmatpush1.bf16.msra.mxu1 %v1890_v17  ;;  %1082 = vmatprep.mubr.f32.mxu1 %v1804_v18 }
 0x8f2   :  { %1688 = vmatprep.subr.bf16.mxu1 %v1896_v19 }
 0x8f5   :  { %1690 = vmatpush1.bf16.msra.mxu1 %v1902_v20 }
 0x8f6   :  { %1692 = vmatprep.subr.bf16.mxu1 %v1906_v21 }
 0x8f9   :  { %1694 = vmatpush1.bf16.msra.mxu1 %v1911_v23 }
 0x8fa   :  { %1696 = vmatprep.subr.bf16.mxu1 %v1915_v25 }
 0x8fd   :  { %1698 = vmatpush1.bf16.msra.mxu1 %v1923_v27 }
 0x8fe   :  { %1716 = vmatprep.subr.bf16.mxu1 %v1888_v16 }
 0x9c3   :  { %v732_v55 = vpop.f32.mrb[2].mxu1 }
 0x9c4   :  { %v750_v56 = vadd.f32 %v1582_v53, %v732_v55  ;;  %v734_v57 = vpop.f32.mrb[3].mxu1 }
 0x9c5   :  { %v737_v58 = vadd.f32 %v1949_v36, %v734_v57 }
 0x9c6   :  { %v1585_v59 = vmul.f32 -1.442695, %v750_v56 }
 0x9c7   :  { %1762 = vtanh.f32 %v737_v58 }
 0x9c8   :  { %1764 = vpow2.f32 %v1585_v59 }
 0x9d1   :  { %v1763_v60 = vpop.eup %1762 }
 0x9d2   :  { %v1765_v62 = vpop.eup %1764  ;;  %v744_v63 = vmul.f32 %v1763_v60, %v742_v61 }
 0x9d3   :  { %v754_v0 = vadd.f32 1.0, %v1765_v62 }
 0x9d4   :  { %746 = vrot.lane.b32.xlu0 %v744_v63, %s1806_s2 }
 0x9d5   :  { %1766 = vrcp.f32 %v754_v0  ;;  %v1595_v0 = vld [vmem:[%s2403_s1 + $0x18] sm:$0xf] }
 0x9df   :  { %v1767_v16 = vpop.eup %1766 }
 0x9e0   :  { %759 = vrot.lane.b32.xlu1 %v1767_v16, %s1806_s2 }
 0xa46   :  { %v747_v3 = vpop.permute.xlu0 %746 }
 0xa47   :  { %v749_v4 = vadd.f32 %v747_v3, %v591_v46 }
 0xa49   :  { %v757_v5 = vmul.f32 %v1767_v16, %v749_v4  ;;  %v1594_v4 = vld [vmem:[%s2402_s0 + $0x18] sm:$0xf] }
 0xa52   :  { %v760_v1 = vpop.permute.xlu1 %759 }
 0xa53   :  { %v762_v2 = vmul.f32 %v1767_v16, %v760_v1 }
 0xa55   :  { %764 = vrot.lane.b32.xlu1 %v762_v2, %s1806_s2 }
 0xac7   :  { %v765_v6 = vpop.permute.xlu1 %764 }
 0xac8   :  { %v767_v7 = vadd.f32 %v765_v6, %v757_v5 }
 0xaca   :  { %1768 = vtanh.f32 %v767_v7 }
 0xad4   :  { %v1769_v8 = vpop.eup %1768 }
 0xad5   :  { %770 = vrot.lane.b32.xlu0 %v1769_v8, %s1806_s2 }
 0xad9   :  { %917 = vperm.xlu0 %1737, %v1587_v9  }
 0xb47   :  { %v771_v10 = vpop.permute.xlu0 %770 }
 0xb48   :  { %v2037_v11 = vmul.f32 %v1767_v16, %v771_v10 }
 0xb4a   :  { %835 = vrot.lane.b32.xlu1 %v2037_v11, %s1807_s7 }
 0xb58   :  { %v918_v31 = vpop.permute.xlu0 %917 }
 0xbbc   :  { %v836_v12 = vpop.permute.xlu1 %835 }
 0xbbd   :  { %v838_v13 = vsel %vm125_vm1, %v836_v12, %v767_v7 }
 0xbbe   :  { %1588 = vmatmul.mubr.msk.f32.vlgmr.msra.gmra.mrb[4].mxu0 %vm127_vm2, %v838_v13 }
 0xbbf   :  { %1702 = vmatpush1.bf16.msra.mxu0 %v1890_v17  ;;  %1258 = vmatprep.mubr.f32.mxu0 %v1804_v18 }
 0xbc0   :  { %1704 = vmatprep.subr.bf16.mxu0 %v1896_v19 }
 0xbc3   :  { %1706 = vmatpush1.bf16.msra.mxu0 %v1902_v20 }
 0xbc4   :  { %1708 = vmatprep.subr.bf16.mxu0 %v1906_v21 }
 0xbc7   :  { %1710 = vmatpush1.bf16.msra.mxu0 %v1911_v23 }
 0xbc8   :  { %1712 = vmatprep.subr.bf16.mxu0 %v1915_v25 }
 0xbcb   :  { %1714 = vmatpush1.bf16.msra.mxu0 %v1923_v27 }
 0xc91   :  { %v908_v22 = vpop.f32.mrb[4].mxu0 }
 0xc92   :  { %v926_v24 = vadd.f32 %v1586_v14, %v908_v22  ;;  %v910_v26 = vpop.f32.mrb[5].mxu0 }
 0xc93   :  { %v913_v28 = vadd.f32 %v1949_v36, %v910_v26 }
 0xc94   :  { %v1589_v29 = vmul.f32 -1.442695, %v926_v24 }
 0xc95   :  { %1770 = vtanh.f32 %v913_v28 }
 0xc96   :  { %1772 = vpow2.f32 %v1589_v29 }
 0xc9f   :  { %v1771_v30 = vpop.eup %1770 }
 0xca0   :  { %v1773_v32 = vpop.eup %1772  ;;  %v920_v33 = vmul.f32 %v1771_v30, %v918_v31 }
 0xca1   :  { %v930_v34 = vadd.f32 1.0, %v1773_v32 }
 0xca2   :  { %922 = vrot.lane.b32.xlu0 %v920_v33, %s1806_s2 }
 0xca3   :  { %1774 = vrcp.f32 %v930_v34 }
 0xcad   :  { %v1775_v35 = vpop.eup %1774 }
 0xcae   :  { %935 = vrot.lane.b32.xlu1 %v1775_v35, %s1806_s2 }
 0xd14   :  { %v923_v39 = vpop.permute.xlu0 %922 }
 0xd15   :  { %v925_v40 = vadd.f32 %v923_v39, %v767_v7 }
 0xd17   :  { %v933_v41 = vmul.f32 %v1775_v35, %v925_v40 }
 0xd20   :  { %v936_v37 = vpop.permute.xlu1 %935 }
 0xd21   :  { %v938_v38 = vmul.f32 %v1775_v35, %v936_v37 }
 0xd23   :  { %940 = vrot.lane.b32.xlu1 %v938_v38, %s1806_s2 }
 0xd95   :  { %v941_v42 = vpop.permute.xlu1 %940 }
 0xd96   :  { %v943_v43 = vadd.f32 %v941_v42, %v933_v41  ;;  %v1598_v41 = vld [vmem:[%s2402_s0 + $0x1c] sm:$0xf] }
 0xd98   :  { %1776 = vtanh.f32 %v943_v43 }
 0xda2   :  { %v1777_v44 = vpop.eup %1776 }
 0xda3   :  { %946 = vrot.lane.b32.xlu0 %v1777_v44, %s1806_s2 }
 0xda7   :  { %1093 = vperm.xlu0 %1737, %v1591_v45  }
 0xe15   :  { %v947_v46 = vpop.permute.xlu0 %946 }
 0xe16   :  { %v2062_v47 = vmul.f32 %v1775_v35, %v947_v46  ;;  %v1599_v35 = vld [vmem:[%s2403_s1 + $0x1c] sm:$0xf] }
 0xe18   :  { %1011 = vrot.lane.b32.xlu1 %v2062_v47, %s1807_s7 }
 0xe8a   :  { %v1012_v48 = vpop.permute.xlu1 %1011 }
 0xe8b   :  { %v1014_v49 = vsel %vm125_vm1, %v1012_v48, %v943_v43 }
 0xe8c   :  { %1592 = vmatmul.mubr.msk.f32.vlgmr.msra.gmra.mrb[4].mxu1 %vm127_vm2, %v1014_v49 }
 0xe8d   :  { %1718 = vmatpush1.bf16.msra.mxu1 %v1890_v17  ;;  %1434 = vmatprep.mubr.f32.mxu1 %v1804_v18 }
 0xe8e   :  { %1720 = vmatprep.subr.bf16.mxu1 %v1896_v19 }
 0xe91   :  { %1722 = vmatpush1.bf16.msra.mxu1 %v1902_v20 }
 0xe92   :  { %1724 = vmatprep.subr.bf16.mxu1 %v1906_v21  ;;  %v1094_v21 = vpop.permute.xlu0 %1093 }
 0xe95   :  { %1726 = vmatpush1.bf16.msra.mxu1 %v1911_v23 }
 0xe96   :  { %1728 = vmatprep.subr.bf16.mxu1 %v1915_v25 }
 0xe99   :  { %1730 = vmatpush1.bf16.msra.mxu1 %v1923_v27 }
 0xf5f   :  { %v1084_v52 = vpop.f32.mrb[4].mxu1 }
 0xf60   :  { %v1102_v17 = vadd.f32 %v1590_v51, %v1084_v52  ;;  %v1086_v53 = vpop.f32.mrb[5].mxu1 }
 0xf61   :  { %v1089_v18 = vadd.f32 %v1949_v36, %v1086_v53 }
 0xf62   :  { %v1593_v19 = vmul.f32 -1.442695, %v1102_v17 }
 0xf63   :  { %1778 = vtanh.f32 %v1089_v18  ;;  %v1808_v18 = vmov 1966171168  }
 0xf64   :  { %1780 = vpow2.f32 %v1593_v19  ;;  %v247_v19 = vunpack.c.l.s4 %v1808_v18 }
 0xf6d   :  { %v1779_v20 = vpop.eup %1778 }
 0xf6e   :  { %v1781_v55 = vpop.eup %1780  ;;  %v1096_v23 = vmul.f32 %v1779_v20, %v1094_v21  ;;  %v249_v20 = vlaneseq }
 0xf6f   :  { %v1106_v56 = vadd.f32 1.0, %v1781_v55 }
 0xf70   :  { %1098 = vrot.lane.b32.xlu0 %v1096_v23, %s1806_s2  ;;  %v250_v21 = vshrl.u32 %v249_v20, 7 }
 0xf71   :  { %1782 = vrcp.f32 %v1106_v56 }
 0xf7b   :  { %v1783_v25 = vpop.eup %1782 }
 0xf7c   :  { %1111 = vrot.lane.b32.xlu1 %v1783_v25, %s1806_s2 }
 0xfe2   :  { %v1099_v58 = vpop.permute.xlu0 %1098 }
 0xfe3   :  { %v1101_v59 = vadd.f32 %v1099_v58, %v943_v43 }
 0xfe5   :  { %v1109_v60 = vmul.f32 %v1783_v25, %v1101_v59 }
 0xfee   :  { %v1112_v27 = vpop.permute.xlu1 %1111 }
 0xfef   :  { %v1114_v57 = vmul.f32 %v1783_v25, %v1112_v27 }
 0xff1   :  { %1116 = vrot.lane.b32.xlu1 %v1114_v57, %s1806_s2 }
0x1063   :  { %v1117_v61 = vpop.permute.xlu1 %1116 }
0x1064   :  { %v1119_v62 = vadd.f32 %v1117_v61, %v1109_v60 }
0x1066   :  { %1784 = vtanh.f32 %v1119_v62 }
0x1070   :  { %v1785_v63 = vpop.eup %1784 }
0x1071   :  { %1122 = vrot.lane.b32.xlu0 %v1785_v63, %s1806_s2 }
0x1075   :  { %1269 = vperm.xlu0 %1737, %v1595_v0  }
0x10e3   :  { %v1123_v16 = vpop.permute.xlu0 %1122 }
0x10e4   :  { %v2087_v1 = vmul.f32 %v1783_v25, %v1123_v16  ;;  %v2129_v25 = vsub.s32 0, %v250_v21 }
0x10e6   :  { %1187 = vrot.lane.b32.xlu1 %v2087_v1, %s1807_s7 }
0x10f4   :  { %v1270_v12 = vpop.permute.xlu0 %1269 }
0x1158   :  { %v1188_v2 = vpop.permute.xlu1 %1187 }
0x1159   :  { %v1190_v3 = vsel %vm125_vm1, %v1188_v2, %v1119_v62 }
0x115a   :  { %1596 = vmatmul.mubr.msk.f32.vlgmr.msra.gmra.mrb[6].mxu0 %vm127_vm2, %v1190_v3 }
0x122d   :  { %v1260_v5 = vpop.f32.mrb[6].mxu0 }
0x122e   :  { %v1278_v6 = vadd.f32 %v1594_v4, %v1260_v5  ;;  %v1262_v7 = vpop.f32.mrb[7].mxu0 }
0x122f   :  { %v1265_v8 = vadd.f32 %v1949_v36, %v1262_v7 }
0x1230   :  { %v1597_v9 = vmul.f32 -1.442695, %v1278_v6 }
0x1231   :  { %1786 = vtanh.f32 %v1265_v8 }
0x1232   :  { %1788 = vpow2.f32 %v1597_v9 }
0x123b   :  { %v1787_v10 = vpop.eup %1786 }
0x123c   :  { %v1789_v13 = vpop.eup %1788  ;;  %v1272_v14 = vmul.f32 %v1787_v10, %v1270_v12 }
0x123d   :  { %v1282_v22 = vadd.f32 1.0, %v1789_v13 }
0x123e   :  { %1274 = vrot.lane.b32.xlu0 %v1272_v14, %s1806_s2 }
0x123f   :  { %1790 = vrcp.f32 %v1282_v22 }
0x1249   :  { %v1791_v24 = vpop.eup %1790 }
0x124a   :  { %1287 = vrot.lane.b32.xlu1 %v1791_v24, %s1806_s2 }
0x12b0   :  { %v1275_v29 = vpop.permute.xlu0 %1274 }
0x12b1   :  { %v1277_v30 = vadd.f32 %v1275_v29, %v1119_v62 }
0x12b3   :  { %v1285_v31 = vmul.f32 %v1791_v24, %v1277_v30 }
0x12bc   :  { %v1288_v26 = vpop.permute.xlu1 %1287 }
0x12bd   :  { %v1290_v28 = vmul.f32 %v1791_v24, %v1288_v26 }
0x12bf   :  { %1292 = vrot.lane.b32.xlu1 %v1290_v28, %s1806_s2 }
0x1331   :  { %v1293_v32 = vpop.permute.xlu1 %1292 }
0x1332   :  { %v2100_v33 = vadd.f32 %v1293_v32, %v1285_v31 }
0x1334   :  { %1792 = vtanh.f32 %v2100_v33 }
0x133e   :  { %v1793_v34 = vpop.eup %1792 }
0x133f   :  { %1298 = vrot.lane.b32.xlu0 %v1793_v34, %s1806_s2 }
0x1343   :  { %1445 = vperm.xlu0 %1737, %v1599_v35  }
0x13b1   :  { %v1299_v37 = vpop.permute.xlu0 %1298 }
0x13b2   :  { %v2107_v38 = vmul.f32 %v1791_v24, %v1299_v37 }
0x13b4   :  { %1363 = vrot.lane.b32.xlu1 %v2107_v38, %s1807_s7 }
0x13c2   :  { %v1446_v49 = vpop.permute.xlu0 %1445 }
0x1426   :  { %v1364_v39 = vpop.permute.xlu1 %1363 }
0x1427   :  { %v1366_v40 = vsel %vm125_vm1, %v1364_v39, %v2100_v33 }
0x1428   :  { %1600 = vmatmul.mubr.msk.f32.vlgmr.msra.gmra.mrb[6].mxu1 %vm127_vm2, %v1366_v40 }
0x14fb   :  { %v1436_v42 = vpop.f32.mrb[6].mxu1 }
0x14fc   :  { %v1454_v43 = vadd.f32 %v1598_v41, %v1436_v42  ;;  %v1438_v44 = vpop.f32.mrb[7].mxu1 }
0x14fd   :  { %v1441_v45 = vadd.f32 %v1949_v36, %v1438_v44  ;;  %v248_v36 = vunpack.c.0.s8 %v247_v19 }
0x14fe   :  { %v1601_v46 = vmul.f32 -1.442695, %v1454_v43 }
0x14ff   :  { %1794 = vtanh.f32 %v1441_v45  ;;  %v2123_v55 = vsub.s32 %v248_v36, %v250_v21 }
0x1500   :  { %1796 = vpow2.f32 %v1601_v46 }
0x1501   :  { %v2127_v23 = vrot.slane %v1959_v54, %v2123_v55  ;;  %v2137_v58 = vrot.slane %v1985_v15, %v2123_v55  ;;  %v2147_v62 = vrot.slane %v2011_v50, %v2123_v55  ;;  %v2157_v2 = vrot.slane %v2037_v11, %v2123_v55 }
0x1502   :  { %v2167_v6 = vrot.slane %v2062_v47, %v2123_v55  ;;  %v2177_v10 = vrot.slane %v2087_v1, %v2123_v55  ;;  %v2187_v22 = vrot.slane %v2107_v38, %v2123_v55 }
0x1503   :  { %v260_v27 = vrot.slane %v2127_v23, %v2123_v55  ;;  %v437_v54 = vrot.slane %v2137_v58, %v2123_v55  ;;  %v613_v0 = vrot.slane %v2147_v62, %v2123_v55  ;;  %v789_v4 = vrot.slane %v2157_v2, %v2123_v55 }
0x1504   :  { %v965_v8 = vrot.slane %v2167_v6, %v2123_v55  ;;  %v1141_v13 = vrot.slane %v2177_v10, %v2123_v55  ;;  %v1317_v26 = vrot.slane %v2187_v22, %v2123_v55  ;;  %v253_v40 = vcombine.high %v2127_v23, %v2127_v23 }
0x1505   :  { %v273_v59 = vrot.slane %v260_v27, %v2129_v25  ;;  %v268_v60 = vcombine.high %v260_v27, %v260_v27  ;;  %v450_v63 = vrot.slane %v437_v54, %v2129_v25  ;;  %v445_v15 = vcombine.high %v437_v54, %v437_v54 }
0x1506   :  { %v626_v3 = vrot.slane %v613_v0, %v2129_v25  ;;  %v621_v50 = vcombine.high %v613_v0, %v613_v0  ;;  %v802_v7 = vrot.slane %v789_v4, %v2129_v25  ;;  %v797_v11 = vcombine.high %v789_v4, %v789_v4 }
0x1507   :  { %v281_v61 = vrot.slane %v268_v60, %v2129_v25  ;;  %v458_v16 = vrot.slane %v445_v15, %v2129_v25  ;;  %v978_v12 = vrot.slane %v965_v8, %v2129_v25  ;;  %v973_v47 = vcombine.high %v965_v8, %v965_v8 }
0x1508   :  { %v634_v5 = vrot.slane %v621_v50, %v2129_v25  ;;  %v810_v9 = vrot.slane %v797_v11, %v2129_v25  ;;  %v1154_v24 = vrot.slane %v1141_v13, %v2129_v25  ;;  %v1149_v1 = vcombine.high %v1141_v13, %v1141_v13 }
0x1509   :  { %v1795_v48 = vpop.eup %1794  ;;  %v986_v14 = vrot.slane %v973_v47, %v2129_v25  ;;  %v1330_v29 = vrot.slane %v1317_v26, %v2129_v25  ;;  %v1325_v30 = vcombine.high %v1317_v26, %v1317_v26  ;;  %v267_v42 = vrot.slane %v253_v40, %v2123_v55 }
0x150a   :  { %v1797_v51 = vpop.eup %1796  ;;  %v1448_v52 = vmul.f32 %v1795_v48, %v1446_v49  ;;  %v1162_v28 = vrot.slane %v1149_v1, %v2129_v25  ;;  %v430_v44 = vcombine.high %v2137_v58, %v2137_v58  ;;  %v1310_v8 = vcombine.high %v2187_v22, %v2187_v22 }
0x150b   :  { %v1458_v17 = vadd.f32 1.0, %v1797_v51  ;;  %v1338_v31 = vrot.slane %v1325_v30, %v2129_v25  ;;  %v277_v46 = vrot.slane %v267_v42, %v2129_v25  ;;  %v269_v48 = vcombine.high %v267_v42, %v267_v42 }
0x150c   :  { %1450 = vrot.lane.b32.xlu0 %v1448_v52, %s1806_s2  ;;  %v444_v52 = vrot.slane %v430_v44, %v2123_v55  ;;  %v1324_v13 = vrot.slane %v1310_v8, %v2123_v55 }
0x150d   :  { %1798 = vrcp.f32 %v1458_v17  ;;  %v285_v51 = vrot.slane %v269_v48, %v2129_v25  ;;  %v606_v17 = vcombine.high %v2147_v62, %v2147_v62 }
0x150e   :  { %v454_v19 = vrot.slane %v444_v52, %v2129_v25  ;;  %v446_v20 = vcombine.high %v444_v52, %v444_v52  ;;  %v1326_v22 = vcombine.high %v1324_v13, %v1324_v13 }
0x150f   :  { %v620_v23 = vrot.slane %v606_v17, %v2123_v55 }
0x1510   :  { %v462_v21 = vrot.slane %v446_v20, %v2129_v25 }
0x1511   :  { %v622_v58 = vcombine.high %v620_v23, %v620_v23 }
0x1513   :  { %v638_v60 = vrot.slane %v622_v58, %v2129_v25 }
0x1517   :  { %v2119_v53 = vpop.eup %1798 }
0x1518   :  { %1463 = vrot.lane.b32.xlu1 %v2119_v53, %s1806_s2 }
0x157e   :  { %v1451_v32 = vpop.permute.xlu0 %1450 }
0x157f   :  { %v1453_v34 = vadd.f32 %v1451_v32, %v2100_v33 }
0x1581   :  { %v1461_v35 = vmul.f32 %v2119_v53, %v1453_v34 }
0x158a   :  { %v1464_v56 = vpop.permute.xlu1 %1463 }
0x158b   :  { %v1466_v57 = vmul.f32 %v2119_v53, %v1464_v56  ;;  %v782_v56 = vcombine.high %v2157_v2, %v2157_v2 }
0x158d   :  { %1468 = vrot.lane.b32.xlu1 %v1466_v57, %s1806_s2  ;;  %v630_v57 = vrot.slane %v620_v23, %v2129_v25  ;;  %v796_v54 = vrot.slane %v782_v56, %v2123_v55 }
0x158f   :  { %v798_v15 = vcombine.high %v796_v54, %v796_v54 }
0x1591   :  { %286 = vrot.lane.b32.xlu1 %v273_v59, %s1807_s7 }
0x1595   :  { %290 = vrot.lane.b32.xlu1 %v281_v61, %s1807_s7  ;;  %v958_v61 = vcombine.high %v2167_v6, %v2167_v6 }
0x1597   :  { %v972_v2 = vrot.slane %v958_v61, %v2123_v55 }
0x1599   :  { %463 = vrot.lane.b32.xlu1 %v450_v63, %s1807_s7  ;;  %v806_v63 = vrot.slane %v796_v54, %v2129_v25  ;;  %v982_v4 = vrot.slane %v972_v2, %v2129_v25 }
0x159d   :  { %467 = vrot.lane.b32.xlu1 %v458_v16, %s1807_s7  ;;  %v814_v16 = vrot.slane %v798_v15, %v2129_v25 }
0x15a1   :  { %639 = vrot.lane.b32.xlu1 %v626_v3, %s1807_s7  ;;  %v1134_v3 = vcombine.high %v2177_v10, %v2177_v10 }
0x15a3   :  { %v1148_v11 = vrot.slane %v1134_v3, %v2123_v55 }
0x15a5   :  { %643 = vrot.lane.b32.xlu1 %v634_v5, %s1807_s7  ;;  %v974_v5 = vcombine.high %v972_v2, %v972_v2  ;;  %v1158_v10 = vrot.slane %v1148_v11, %v2129_v25 }
0x15a9   :  { %815 = vrot.lane.b32.xlu1 %v802_v7, %s1807_s7  ;;  %v990_v7 = vrot.slane %v974_v5, %v2129_v25 }
0x15ad   :  { %819 = vrot.lane.b32.xlu1 %v810_v9, %s1807_s7 }
0x15b1   :  { %991 = vrot.lane.b32.xlu1 %v978_v12, %s1807_s7  ;;  %v1150_v12 = vcombine.high %v1148_v11, %v1148_v11 }
0x15b3   :  { %v1166_v47 = vrot.slane %v1150_v12, %v2129_v25 }
0x15b5   :  { %995 = vrot.lane.b32.xlu1 %v986_v14, %s1807_s7  ;;  %v1334_v14 = vrot.slane %v1324_v13, %v2129_v25 }
0x15b9   :  { %1167 = vrot.lane.b32.xlu1 %v1154_v24, %s1807_s7  ;;  %v1342_v24 = vrot.slane %v1326_v22, %v2129_v25 }
0x15bd   :  { %1171 = vrot.lane.b32.xlu1 %v1162_v28, %s1807_s7 }
0x15c1   :  { %1343 = vrot.lane.b32.xlu1 %v1330_v29, %s1807_s7 }
0x15c5   :  { %1347 = vrot.lane.b32.xlu1 %v1338_v31, %s1807_s7 }
0x15ff   :  { %v1469_v37 = vpop.permute.xlu1 %1468 }
0x1600   :  { %v2201_v38 = vadd.f32 %v1469_v37, %v1461_v35 }
0x1602   :  { %1800 = vtanh.f32 %v2201_v38 }
0x1603   :  { %v287_v39 = vpop.permute.xlu1 %286 }
0x1604   :  { %299 = vst.msk [vmem:[%s2406_s4] sm:$0x1] %vm298_vm3, %v287_v39 }
0x1607   :  { %v291_v41 = vpop.permute.xlu1 %290 }
0x1608   :  { %301 = vst.msk [vmem:[%s2406_s4 + $0x10] sm:$0x1] %vm298_vm3, %v291_v41 }
0x160b   :  { %v464_v33 = vpop.permute.xlu1 %463 }
0x160c   :  { %v1801_v43 = vpop.eup %1800  ;;  %475 = vst.msk [vmem:[%s2406_s4 + $0x1] sm:$0x1] %vm298_vm3, %v464_v33 }
0x160d   :  { %1474 = vrot.lane.b32.xlu0 %v1801_v43, %s1806_s2  ;;  %s1809_s2 = smov 96  }
0x160f   :  { %v468_v45 = vpop.permute.xlu1 %467 }
0x1610   :  { %477 = vst.msk [vmem:[%s2406_s4 + $0x11] sm:$0x1] %vm298_vm3, %v468_v45 }
0x1611   :  { %288 = vrot.lane.b32.xlu0 %v277_v46, %s1807_s7 }
0x1613   :  { %v640_v49 = vpop.permute.xlu1 %639 }
0x1614   :  { %651 = vst.msk [vmem:[%s2406_s4 + $0x2] sm:$0x1] %vm298_vm3, %v640_v49 }
0x1615   :  { %292 = vrot.lane.b32.xlu0 %v285_v51, %s1807_s7 }
0x1617   :  { %v644_v18 = vpop.permute.xlu1 %643 }
0x1618   :  { %653 = vst.msk [vmem:[%s2406_s4 + $0x12] sm:$0x1] %vm298_vm3, %v644_v18 }
0x1619   :  { %465 = vrot.lane.b32.xlu0 %v454_v19, %s1807_s7 }
0x161b   :  { %v816_v36 = vpop.permute.xlu1 %815 }
0x161c   :  { %827 = vst.msk [vmem:[%s2406_s4 + $0x3] sm:$0x1] %vm298_vm3, %v816_v36 }
0x161d   :  { %469 = vrot.lane.b32.xlu0 %v462_v21, %s1807_s7 }
0x161f   :  { %v820_v27 = vpop.permute.xlu1 %819 }
0x1620   :  { %829 = vst.msk [vmem:[%s2406_s4 + $0x13] sm:$0x1] %vm298_vm3, %v820_v27 }
0x1621   :  { %641 = vrot.lane.b32.xlu0 %v630_v57, %s1807_s7 }
0x1623   :  { %v992_v59 = vpop.permute.xlu1 %991 }
0x1624   :  { %1003 = vst.msk [vmem:[%s2406_s4 + $0x4] sm:$0x1] %vm298_vm3, %v992_v59 }
0x1625   :  { %645 = vrot.lane.b32.xlu0 %v638_v60, %s1807_s7 }
0x1627   :  { %v996_v62 = vpop.permute.xlu1 %995 }
0x1628   :  { %1005 = vst.msk [vmem:[%s2406_s4 + $0x14] sm:$0x1] %vm298_vm3, %v996_v62 }
0x1629   :  { %817 = vrot.lane.b32.xlu0 %v806_v63, %s1807_s7 }
0x162b   :  { %v1168_v0 = vpop.permute.xlu1 %1167 }
0x162c   :  { %1179 = vst.msk [vmem:[%s2406_s4 + $0x5] sm:$0x1] %vm298_vm3, %v1168_v0 }
0x162d   :  { %821 = vrot.lane.b32.xlu0 %v814_v16, %s1807_s7 }
0x162f   :  { %v1172_v50 = vpop.permute.xlu1 %1171 }
0x1630   :  { %1181 = vst.msk [vmem:[%s2406_s4 + $0x15] sm:$0x1] %vm298_vm3, %v1172_v50 }
0x1631   :  { %993 = vrot.lane.b32.xlu0 %v982_v4, %s1807_s7 }
0x1633   :  { %v1344_v6 = vpop.permute.xlu1 %1343 }
0x1634   :  { %1355 = vst.msk [vmem:[%s2406_s4 + $0x6] sm:$0x1] %vm298_vm3, %v1344_v6 }
0x1635   :  { %997 = vrot.lane.b32.xlu0 %v990_v7, %s1807_s7 }
0x1637   :  { %v1348_v9 = vpop.permute.xlu1 %1347 }
0x1638   :  { %1357 = vst.msk [vmem:[%s2406_s4 + $0x16] sm:$0x1] %vm298_vm3, %v1348_v9 }
0x1639   :  { %1169 = vrot.lane.b32.xlu0 %v1158_v10, %s1807_s7 }
0x163d   :  { %1173 = vrot.lane.b32.xlu0 %v1166_v47, %s1807_s7 }
0x1641   :  { %1345 = vrot.lane.b32.xlu0 %v1334_v14, %s1807_s7 }
0x1645   :  { %1349 = vrot.lane.b32.xlu0 %v1342_v24, %s1807_s7 }
0x167f   :  { %v1475_v1 = vpop.permute.xlu0 %1474 }
0x1680   :  { %v1477_v26 = vmul.f32 %v2119_v53, %v1475_v1 }
0x1682   :  { %v1485_v28 = vrot.slane %v1477_v26, %v2123_v55 }
0x1683   :  { %v289_v29 = vpop.permute.xlu0 %288 }
0x1684   :  { %v1486_v30 = vcombine.high %v1485_v28, %v1485_v28  ;;  %v1493_v31 = vrot.slane %v1485_v28, %v2123_v55  ;;  %300 = vst.msk [vmem:[%s2406_s4 + $0x8] sm:$0x1] %vm298_vm3, %v289_v29 }
0x1686   :  { %v1506_v32 = vrot.slane %v1493_v31, %v2129_v25  ;;  %v1500_v34 = vrot.slane %v1486_v30, %v2123_v55  ;;  %v1501_v35 = vcombine.high %v1493_v31, %v1493_v31 }
0x1687   :  { %v293_v37 = vpop.permute.xlu0 %292 }
0x1688   :  { %302 = vst.msk [vmem:[%s2406_s4 + $0x18] sm:$0x1] %vm298_vm3, %v293_v37  ;;  %1519 = vrot.lane.b32.xlu1 %v1506_v32, %s1807_s7  ;;  %v1510_v53 = vrot.slane %v1500_v34, %v2129_v25  ;;  %v1502_v39 = vcombine.high %v1500_v34, %v1500_v34  ;;  %v1514_v40 = vrot.slane %v1501_v35, %v2129_v25 }
0x168a   :  { %1521 = vrot.lane.b32.xlu0 %v1510_v53, %s1807_s7  ;;  %v1518_v55 = vrot.slane %v1502_v39, %v2129_v25 }
0x168b   :  { %v466_v41 = vpop.permute.xlu0 %465 }
0x168c   :  { %476 = vst.msk [vmem:[%s2406_s4 + $0x9] sm:$0x1] %vm298_vm3, %v466_v41  ;;  %1523 = vrot.lane.b32.xlu1 %v1514_v40, %s1807_s7 }
0x168e   :  { %1525 = vrot.lane.b32.xlu0 %v1518_v55, %s1807_s7 }
0x168f   :  { %v470_v33 = vpop.permute.xlu0 %469 }
0x1690   :  { %478 = vst.msk [vmem:[%s2406_s4 + $0x19] sm:$0x1] %vm298_vm3, %v470_v33  ;;  %1535 = vrot.lane.b32.xlu1 %v1477_v26, %s1807_s7 }
0x1692   :  { %1541 = vrot.lane.b32.xlu0 %v2201_v38, %s1809_s2 }
0x1693   :  { %v642_v42 = vpop.permute.xlu0 %641 }
0x1694   :  { %652 = vst.msk [vmem:[%s2406_s4 + $0xa] sm:$0x1] %vm298_vm3, %v642_v42 }
0x1697   :  { %v646_v25 = vpop.permute.xlu0 %645 }
0x1698   :  { %654 = vst.msk [vmem:[%s2406_s4 + $0x1a] sm:$0x1] %vm298_vm3, %v646_v25 }
0x169b   :  { %v818_v43 = vpop.permute.xlu0 %817 }
0x169c   :  { %828 = vst.msk [vmem:[%s2406_s4 + $0xb] sm:$0x1] %vm298_vm3, %v818_v43 }
0x169f   :  { %v822_v44 = vpop.permute.xlu0 %821 }
0x16a0   :  { %830 = vst.msk [vmem:[%s2406_s4 + $0x1b] sm:$0x1] %vm298_vm3, %v822_v44 }
0x16a3   :  { %v994_v38 = vpop.permute.xlu0 %993 }
0x16a4   :  { %1004 = vst.msk [vmem:[%s2406_s4 + $0xc] sm:$0x1] %vm298_vm3, %v994_v38 }
0x16a7   :  { %v998_v45 = vpop.permute.xlu0 %997 }
0x16a8   :  { %1006 = vst.msk [vmem:[%s2406_s4 + $0x1c] sm:$0x1] %vm298_vm3, %v998_v45 }
0x16ab   :  { %v1170_v46 = vpop.permute.xlu0 %1169 }
0x16ac   :  { %1180 = vst.msk [vmem:[%s2406_s4 + $0xd] sm:$0x1] %vm298_vm3, %v1170_v46 }
0x16af   :  { %v1174_v48 = vpop.permute.xlu0 %1173 }
0x16b0   :  { %1182 = vst.msk [vmem:[%s2406_s4 + $0x1d] sm:$0x1] %vm298_vm3, %v1174_v48 }
0x16b3   :  { %v1346_v49 = vpop.permute.xlu0 %1345 }
0x16b4   :  { %1356 = vst.msk [vmem:[%s2406_s4 + $0xe] sm:$0x1] %vm298_vm3, %v1346_v49 }
0x16b7   :  { %v1350_v51 = vpop.permute.xlu0 %1349 }
0x16b8   :  { %1358 = vst.msk [vmem:[%s2406_s4 + $0x1e] sm:$0x1] %vm298_vm3, %v1350_v51 }
0x16fa   :  { %v1520_v52 = vpop.permute.xlu1 %1519 }
0x16fb   :  { %1531 = vst.msk [vmem:[%s2406_s4 + $0x7] sm:$0x1] %vm298_vm3, %v1520_v52 }
0x16fc   :  { %v1522_v17 = vpop.permute.xlu0 %1521 }
0x16fd   :  { %1532 = vst.msk [vmem:[%s2406_s4 + $0xf] sm:$0x1] %vm298_vm3, %v1522_v17 }
0x16fe   :  { %v1524_v18 = vpop.permute.xlu1 %1523 }
0x16ff   :  { %1533 = vst.msk [vmem:[%s2406_s4 + $0x17] sm:$0x1] %vm298_vm3, %v1524_v18 }
0x1700   :  { %v1526_v19 = vpop.permute.xlu0 %1525 }
0x1701   :  { %1534 = vst.msk [vmem:[%s2406_s4 + $0x1f] sm:$0x1] %vm298_vm3, %v1526_v19 }
0x1702   :  { %v1536_v20 = vpop.permute.xlu1 %1535 }
0x1703   :  { %1539 = vst.msk [vmem:[#allocation3] sm:$0xf] %vm97_vm0, %v1536_v20 }
0x1704   :  { %v1542_v36 = vpop.permute.xlu0 %1541 }
0x1705   :  { %1544 = vst.msk [vmem:[#allocation4] sm:$0xf] %vm97_vm0, %v1542_v36  ;;  %1548 = vst.msk [vmem:[%s2407_s5] sm:$0xf] %vm97_vm0, %v1542_v36 }
0x1706   :  { %1557 = vsyncmov [#allocation5] }
0x1709   :  { %s1558_s16 = vpop.sfrf %1557 }
0x170a   :  { %p1602_p0 = scmp.ne.s32.totalorder %s1558_s16, 0 }
0x170c   :  { %1562 = shalt.err (%p1602_p0)  }

</bundles_post_ra>
